<compile_context>
chip_gen: v6e
topology: v6e:2x2x1
jax: 0.10.0
libtpu: 0.0.40
codegen_flags: <defaults>
</compile_context>

<pallas_src>
import functools

import jax
import jax.numpy as jnp
from jax import lax
from jax.experimental import pallas as pl
from jax.experimental.pallas import tpu as pltpu


# packed vec_e row layout (offset 0 for layer 1, 9 for layer 2)
_BQ, _BK, _BV, _BO, _LN1G, _LN1B, _B2, _LN2G, _LN2B = range(9)


# ----------------------------- fused CCAB kernel -----------------------------

def _ccab_kernel(num_heads, Bt, L, S, E, scale, has_mask, x_ref, key_ref, *refs):
    """One grid step = Bt batches; both transformer layers computed fully in VMEM."""
    f32 = jnp.float32
    bf16 = jnp.bfloat16
    hd = E // num_heads

    if has_mask:
        mask_ref, *refs = refs
        mask = mask_ref[...]                      # (Bt, 1, S) additive f32
    else:
        mask = None
    (wq1_ref, wkv1_ref, wo1_ref, w11_ref, w21_ref,
     wqkv2_ref, wo2_ref, w12_ref, w22_ref, vece_ref, vecf_ref, o_ref) = refs

    def ve(layer, idx):                           # (1, E) f32 bias / LN row
        r = 9 * layer + idx
        return vece_ref[r:r + 1, :]

    def layer_norm(y, layer, g_idx, b_idx):       # stats in f32
        mu = jnp.mean(y, axis=-1, keepdims=True)
        c = y - mu
        var = jnp.mean(c * c, axis=-1, keepdims=True)
        return c * lax.rsqrt(var + 1e-5) * ve(layer, g_idx) + ve(layer, b_idx)

    def mha(q, kk, vv, lq, lk, msk, wo_ref):
        """q:(Bt*lq,E) f32 (bias added), kk/vv:(Bt*lk,E) f32, msk:(Bt,1,lk) or None.
        Returns the out-projection (no bias): sum_h (softmax(q_h k_h^T) v_h) @ Wo_h."""
        q3 = (q * scale).reshape(Bt, lq, E).astype(bf16)
        k3 = kk.reshape(Bt, lk, E).astype(bf16)
        v3 = vv.reshape(Bt, lk, E).astype(bf16)
        acc = jnp.zeros((Bt * lq, E), f32)
        for h in range(num_heads):                # static unroll; no concatenates
            sl = slice(h * hd, (h + 1) * hd)
            s = jnp.einsum('bqd,bkd->bqk', q3[:, :, sl], k3[:, :, sl],
                           preferred_element_type=f32)            # (Bt, lq, lk)
            if msk is not None:
                s = s + msk
            s = s - jnp.max(s, axis=-1, keepdims=True)
            p = jnp.exp(s)
            p = p * pl.reciprocal(jnp.sum(p, axis=-1, keepdims=True), approx=True)
            o = jnp.einsum('bqk,bkd->bqd', p.astype(bf16), v3[:, :, sl],
                           preferred_element_type=f32)            # (Bt, lq, hd)
            acc = acc + jnp.dot(o.reshape(Bt * lq, hd).astype(bf16), wo_ref[sl, :],
                                preferred_element_type=f32)       # accumulate out-proj
        return acc

    x = x_ref[...]                                # (Bt*L, E)  bf16
    key = key_ref[...]                            # (Bt*S, Kd) bf16

    # ---------------- block 1: cross-attention transformer layer ----------------
    q = jnp.dot(x, wq1_ref[...], preferred_element_type=f32) + ve(0, _BQ)
    kv = jnp.dot(key, wkv1_ref[...], preferred_element_type=f32)  # fused K|V, (Bt*S, 2E)
    k1 = kv[:, :E] + ve(0, _BK)
    v1 = kv[:, E:] + ve(0, _BV)
    y = mha(q, k1, v1, L, S, mask, wo1_ref) + ve(0, _BO) + x.astype(f32)
    y = layer_norm(y, 0, _LN1G, _LN1B)
    h1 = jnp.maximum(jnp.dot(y.astype(bf16), w11_ref[...],
                             preferred_element_type=f32) + vecf_ref[0:1, :], 0.0)
    y = layer_norm(y + jnp.dot(h1.astype(bf16), w21_ref[...],
                               preferred_element_type=f32) + ve(0, _B2),
                   0, _LN2G, _LN2B)

    # ---------------- block 2: self-attention transformer layer (no mask) -------
    qkv = jnp.dot(y.astype(bf16), wqkv2_ref[...],
                  preferred_element_type=f32)                     # fused Q|K|V, (Bt*L, 3E)
    q2 = qkv[:, :E] + ve(1, _BQ)
    k2 = qkv[:, E:2 * E] + ve(1, _BK)
    v2 = qkv[:, 2 * E:] + ve(1, _BV)
    z = mha(q2, k2, v2, L, L, None, wo2_ref) + ve(1, _BO) + y
    z = layer_norm(z, 1, _LN1G, _LN1B)
    h2 = jnp.maximum(jnp.dot(z.astype(bf16), w12_ref[...],
                             preferred_element_type=f32) + vecf_ref[1:2, :], 0.0)
    z = layer_norm(z + jnp.dot(h2.astype(bf16), w22_ref[...],
                               preferred_element_type=f32) + ve(1, _B2),
                   1, _LN2G, _LN2B)

    o_ref[...] = z.astype(o_ref.dtype)


# ----------------------------- pallas_call wrapper -----------------------------

def single_ccab_forward(x, k, key_padding_mask, params, num_heads):
    """x: (L, B, E) seq-first, k: (S, B, Kd), key_padding_mask: (B, S) bool (True = pad)."""
    L, B, E = x.shape
    S, _, Kd = k.shape
    assert E % num_heads == 0, "embed_dim must be divisible by num_heads"
    p1, p2 = params["block1"], params["block2"]
    F = p1["W1"].shape[1]
    hd = E // num_heads
    scale = float(hd) ** -0.5
    bf16 = jnp.bfloat16

    # layout glue (once, host-side): batch-first then merge batch into the matmul M dim
    x2 = jnp.transpose(x, (1, 0, 2)).reshape(B * L, E).astype(bf16)
    k2 = jnp.transpose(k, (1, 0, 2)).reshape(B * S, Kd).astype(bf16)

    has_mask = key_padding_mask is not None
    if has_mask:
        mask = jnp.where(key_padding_mask, jnp.float32(-1e9),
                         jnp.float32(0.0))[:, None, :]            # (B, 1, S) additive

    # bf16 weights, fused projections
    wq1 = p1["Wq"].astype(bf16)
    wkv1 = jnp.concatenate([p1["Wk"], p1["Wv"]], axis=1).astype(bf16)          # (Kd, 2E)
    wo1 = p1["Wo"].astype(bf16)
    w11, w21 = p1["W1"].astype(bf16), p1["W2"].astype(bf16)
    wqkv2 = jnp.concatenate([p2["Wq"], p2["Wk"], p2["Wv"]], axis=1).astype(bf16)  # (E, 3E)
    wo2 = p2["Wo"].astype(bf16)
    w12, w22 = p2["W1"].astype(bf16), p2["W2"].astype(bf16)

    # pack the small bias / LayerNorm vectors into two operands (f32)
    def vec_rows(p):
        return [p["bq"], p["bk"], p["bv"], p["bo"], p["ln1_g"], p["ln1_b"],
                p["b2"], p["ln2_g"], p["ln2_b"]]
    vec_e = jnp.stack(vec_rows(p1) + vec_rows(p2), axis=0).astype(jnp.float32)  # (18, E)
    vec_f = jnp.stack([p1["b1"], p2["b1"]], axis=0).astype(jnp.float32)         # (2, F)

    # batch tile: aim for ~256 MXU rows per grid step (Bt must divide B)
    Bt = max(1, min(B, 256 // max(L, 1)))
    while B % Bt:
        Bt -= 1
    grid = (B // Bt,)

    def wspec(shape):  # whole-array block, constant index -> resident in VMEM across grid
        nd = len(shape)
        return pl.BlockSpec(shape, lambda t: (0,) * nd)

    weights = [wq1, wkv1, wo1, w11, w21, wqkv2, wo2, w12, w22, vec_e, vec_f]

    in_specs = [pl.BlockSpec((Bt * L, E), lambda t: (t, 0)),
                pl.BlockSpec((Bt * S, Kd), lambda t: (t, 0))]
    operands = [x2, k2]
    if has_mask:
        in_specs.append(pl.BlockSpec((Bt, 1, S), lambda t: (t, 0, 0)))
        operands.append(mask)
    in_specs += [wspec(w.shape) for w in weights]
    operands += weights

    kernel = functools.partial(_ccab_kernel, num_heads, Bt, L, S, E, scale, has_mask)

    out = pl.pallas_call(
        kernel,
        out_shape=jax.ShapeDtypeStruct((B * L, E), jnp.float32),
        grid=grid,
        in_specs=in_specs,
        out_specs=pl.BlockSpec((Bt * L, E), lambda t: (t, 0)),
        compiler_params=pltpu.CompilerParams(dimension_semantics=("parallel",)),
    )(*operands)

    return out.reshape(B, L, E).transpose(1, 0, 2)        # back to (L, B, E)


# ----------------------------- parameter init -----------------------------

def init_block_params(key, embed_dim, kdim, ffn_dim):
    ks = jax.random.split(key, 8)
    s = 0.02
    return {
        "Wq": s * jax.random.normal(ks[0], (embed_dim, embed_dim), jnp.float32),
        "bq": jnp.zeros((embed_dim,), jnp.float32),
        "Wk": s * jax.random.normal(ks[1], (kdim, embed_dim), jnp.float32),
        "bk": jnp.zeros((embed_dim,), jnp.float32),
        "Wv": s * jax.random.normal(ks[2], (kdim, embed_dim), jnp.float32),
        "bv": jnp.zeros((embed_dim,), jnp.float32),
        "Wo": s * jax.random.normal(ks[3], (embed_dim, embed_dim), jnp.float32),
        "bo": jnp.zeros((embed_dim,), jnp.float32),
        "ln1_g": jnp.ones((embed_dim,), jnp.float32),
        "ln1_b": jnp.zeros((embed_dim,), jnp.float32),
        "W1": s * jax.random.normal(ks[4], (embed_dim, ffn_dim), jnp.float32),
        "b1": jnp.zeros((ffn_dim,), jnp.float32),
        "W2": s * jax.random.normal(ks[5], (ffn_dim, embed_dim), jnp.float32),
        "b2": jnp.zeros((embed_dim,), jnp.float32),
        "ln2_g": jnp.ones((embed_dim,), jnp.float32),
        "ln2_b": jnp.zeros((embed_dim,), jnp.float32),
    }


# ----------------------------- main -----------------------------

if __name__ == "__main__":
    embed_dim, kdim, ffn_dim, num_heads = 32, 16, 64, 4
    L, S, B = 8, 8, 2   # tgt seq, src seq, batch

    root = jax.random.PRNGKey(0)
    k_params1, k_params2, k_x, k_k = jax.random.split(root, 4)

    params = {
        "block1": init_block_params(k_params1, embed_dim, kdim, ffn_dim),       # cross-attn
        "block2": init_block_params(k_params2, embed_dim, embed_dim, ffn_dim),  # self-attn
    }

    x = jax.random.normal(k_x, (L, B, embed_dim), jnp.float32)      # (L, B, E)
    k = jax.random.normal(k_k, (S, B, kdim), jnp.float32)           # (S, B, Kd)
    # True = padded key position (last 2 keys of batch 1 are padding)
    key_padding_mask = jnp.zeros((B, S), jnp.bool_).at[1, -2:].set(True)

    fwd = jax.jit(functools.partial(single_ccab_forward, num_heads=num_heads))
    out = fwd(x, k, key_padding_mask, params)
    jax.block_until_ready(out)

    assert out.shape == (L, B, embed_dim)
    assert bool(jnp.all(jnp.isfinite(out)))
    print("KERNEL_OK")
</pallas_src>

<mosaic_0001>
module attributes {stable_mosaic.version = 11 : i64} {
  func.func @_ccab_kernel(%arg0: i32, %arg1: memref<16x32xbf16, #tpu.memory_space<vmem>>, %arg2: memref<16x16xbf16, #tpu.memory_space<vmem>>, %arg3: memref<2x1x8xf32, #tpu.memory_space<vmem>>, %arg4: memref<32x32xbf16, #tpu.memory_space<vmem>>, %arg5: memref<16x64xbf16, #tpu.memory_space<vmem>>, %arg6: memref<32x32xbf16, #tpu.memory_space<vmem>>, %arg7: memref<32x64xbf16, #tpu.memory_space<vmem>>, %arg8: memref<64x32xbf16, #tpu.memory_space<vmem>>, %arg9: memref<32x96xbf16, #tpu.memory_space<vmem>>, %arg10: memref<32x32xbf16, #tpu.memory_space<vmem>>, %arg11: memref<32x64xbf16, #tpu.memory_space<vmem>>, %arg12: memref<64x32xbf16, #tpu.memory_space<vmem>>, %arg13: memref<18x32xf32, #tpu.memory_space<vmem>>, %arg14: memref<2x64xf32, #tpu.memory_space<vmem>>, %arg15: memref<16x32xf32, #tpu.memory_space<vmem>>) attributes {dimension_semantics = [#tpu.dimension_semantics<parallel>], iteration_bounds = array<i64: 1>, scalar_prefetch = 0 : i64, scratch_operands = 0 : i64, tpu.core_type = #tpu.core_type<tc>, window_params = [{transform_indices = @transform_0, window_bounds = array<i64: 16, 32>}, {transform_indices = @transform_1, window_bounds = array<i64: 16, 16>}, {transform_indices = @transform_2, window_bounds = array<i64: 2, 1, 8>}, {pipeline_mode = #tpu.pipeline_mode<synchronous>, transform_indices = @transform_3, window_bounds = array<i64: 32, 32>}, {pipeline_mode = #tpu.pipeline_mode<synchronous>, transform_indices = @transform_4, window_bounds = array<i64: 16, 64>}, {pipeline_mode = #tpu.pipeline_mode<synchronous>, transform_indices = @transform_5, window_bounds = array<i64: 32, 32>}, {pipeline_mode = #tpu.pipeline_mode<synchronous>, transform_indices = @transform_6, window_bounds = array<i64: 32, 64>}, {pipeline_mode = #tpu.pipeline_mode<synchronous>, transform_indices = @transform_7, window_bounds = array<i64: 64, 32>}, {pipeline_mode = #tpu.pipeline_mode<synchronous>, transform_indices = @transform_8, window_bounds = array<i64: 32, 96>}, {pipeline_mode = #tpu.pipeline_mode<synchronous>, transform_indices = @transform_9, window_bounds = array<i64: 32, 32>}, {pipeline_mode = #tpu.pipeline_mode<synchronous>, transform_indices = @transform_10, window_bounds = array<i64: 32, 64>}, {pipeline_mode = #tpu.pipeline_mode<synchronous>, transform_indices = @transform_11, window_bounds = array<i64: 64, 32>}, {pipeline_mode = #tpu.pipeline_mode<synchronous>, transform_indices = @transform_12, window_bounds = array<i64: 18, 32>}, {pipeline_mode = #tpu.pipeline_mode<synchronous>, transform_indices = @transform_13, window_bounds = array<i64: 2, 64>}, {transform_indices = @transform_14, window_bounds = array<i64: 16, 32>}]} {
    %c0 = arith.constant 0 : index
    %c0_0 = arith.constant 0 : index
    %c0_1 = arith.constant 0 : index
    %0 = vector.load %arg3[%c0, %c0_0, %c0_1] : memref<2x1x8xf32, #tpu.memory_space<vmem>>, vector<2x1x8xf32>
    %c0_2 = arith.constant 0 : index
    %c0_3 = arith.constant 0 : index
    %1 = vector.load %arg1[%c0_2, %c0_3] : memref<16x32xbf16, #tpu.memory_space<vmem>>, vector<16x32xbf16>
    %c0_4 = arith.constant 0 : index
    %c0_5 = arith.constant 0 : index
    %2 = vector.load %arg2[%c0_4, %c0_5] : memref<16x16xbf16, #tpu.memory_space<vmem>>, vector<16x16xbf16>
    %c0_6 = arith.constant 0 : index
    %c0_7 = arith.constant 0 : index
    %3 = vector.load %arg4[%c0_6, %c0_7] : memref<32x32xbf16, #tpu.memory_space<vmem>>, vector<32x32xbf16>
    %cst = arith.constant dense<0.000000e+00> : vector<16x32xf32>
    %4 = tpu.matmul %1, %3, %cst {dimension_numbers = #tpu.dot_dimension_numbers<[1], [0], [0], [1], [0, 0, 1, 1], [], []>} : vector<16x32xbf16>, vector<32x32xbf16>, vector<16x32xf32> -> vector<16x32xf32>
    %c0_8 = arith.constant 0 : index
    %c0_9 = arith.constant 0 : index
    %5 = vector.load %arg13[%c0_8, %c0_9] : memref<18x32xf32, #tpu.memory_space<vmem>>, vector<1x32xf32>
    %6 = vector.broadcast %5 : vector<1x32xf32> to vector<16x32xf32>
    %7 = arith.addf %4, %6 : vector<16x32xf32>
    %c0_10 = arith.constant 0 : index
    %c0_11 = arith.constant 0 : index
    %8 = vector.load %arg5[%c0_10, %c0_11] : memref<16x64xbf16, #tpu.memory_space<vmem>>, vector<16x64xbf16>
    %cst_12 = arith.constant dense<0.000000e+00> : vector<16x64xf32>
    %9 = tpu.matmul %2, %8, %cst_12 {dimension_numbers = #tpu.dot_dimension_numbers<[1], [0], [0], [1], [0, 0, 1, 1], [], []>} : vector<16x16xbf16>, vector<16x64xbf16>, vector<16x64xf32> -> vector<16x64xf32>
    %10 = vector.extract_strided_slice %9 {offsets = [0, 0], sizes = [16, 32], strides = [1, 1]} : vector<16x64xf32> to vector<16x32xf32>
    %c1 = arith.constant 1 : index
    %c0_13 = arith.constant 0 : index
    %11 = vector.load %arg13[%c1, %c0_13] : memref<18x32xf32, #tpu.memory_space<vmem>>, vector<1x32xf32>
    %12 = vector.broadcast %11 : vector<1x32xf32> to vector<16x32xf32>
    %13 = arith.addf %10, %12 : vector<16x32xf32>
    %14 = vector.extract_strided_slice %9 {offsets = [0, 32], sizes = [16, 32], strides = [1, 1]} : vector<16x64xf32> to vector<16x32xf32>
    %c2 = arith.constant 2 : index
    %c0_14 = arith.constant 0 : index
    %15 = vector.load %arg13[%c2, %c0_14] : memref<18x32xf32, #tpu.memory_space<vmem>>, vector<1x32xf32>
    %16 = vector.broadcast %15 : vector<1x32xf32> to vector<16x32xf32>
    %17 = arith.addf %14, %16 : vector<16x32xf32>
    %cst_15 = arith.constant 0.353553385 : f32
    %18 = vector.broadcast %cst_15 : f32 to vector<16x32xf32>
    %19 = arith.mulf %7, %18 : vector<16x32xf32>
    %20 = vector.shape_cast %19 : vector<16x32xf32> to vector<2x8x32xf32>
    %21 = arith.truncf %20 : vector<2x8x32xf32> to vector<2x8x32xbf16>
    %22 = vector.shape_cast %13 : vector<16x32xf32> to vector<2x8x32xf32>
    %23 = arith.truncf %22 : vector<2x8x32xf32> to vector<2x8x32xbf16>
    %24 = vector.shape_cast %17 : vector<16x32xf32> to vector<2x8x32xf32>
    %25 = arith.truncf %24 : vector<2x8x32xf32> to vector<2x8x32xbf16>
    %cst_16 = arith.constant 0.000000e+00 : f32
    %26 = vector.broadcast %cst_16 : f32 to vector<16x32xf32>
    %27 = vector.extract_strided_slice %21 {offsets = [0, 0, 0], sizes = [2, 8, 8], strides = [1, 1, 1]} : vector<2x8x32xbf16> to vector<2x8x8xbf16>
    %28 = vector.extract_strided_slice %23 {offsets = [0, 0, 0], sizes = [2, 8, 8], strides = [1, 1, 1]} : vector<2x8x32xbf16> to vector<2x8x8xbf16>
    "tpu.trace_start"() <{level = 10 : i32, message = "bqd,bkd->bqk"}> : () -> ()
    %cst_17 = arith.constant dense<0.000000e+00> : vector<2x8x8xf32>
    %29 = tpu.matmul %27, %28, %cst_17 {dimension_numbers = #tpu.dot_dimension_numbers<[2], [2], [1], [1], [0, 0, 0, 1, 1, 1], [0], [0]>} : vector<2x8x8xbf16>, vector<2x8x8xbf16>, vector<2x8x8xf32> -> vector<2x8x8xf32>
    "tpu.trace_stop"() : () -> ()
    %30 = vector.broadcast %0 : vector<2x1x8xf32> to vector<2x8x8xf32>
    %31 = arith.addf %29, %30 : vector<2x8x8xf32>
    %cst_18 = arith.constant dense<0xFF800000> : vector<2x8xf32>
    %32 = vector.multi_reduction <maximumf>, %31, %cst_18 [2] : vector<2x8x8xf32> to vector<2x8xf32>
    %33 = vector.shape_cast %32 : vector<2x8xf32> to vector<2x8x1xf32>
    %34 = vector.broadcast %33 : vector<2x8x1xf32> to vector<2x8x8xf32>
    %35 = arith.subf %31, %34 : vector<2x8x8xf32>
    %36 = math.exp %35 : vector<2x8x8xf32>
    %cst_19 = arith.constant dense<0.000000e+00> : vector<2x8xf32>
    %37 = vector.multi_reduction <add>, %36, %cst_19 [2] : vector<2x8x8xf32> to vector<2x8xf32>
    %38 = vector.shape_cast %37 : vector<2x8xf32> to vector<2x8x1xf32>
    %39 = tpu.reciprocal %38 {approx = true} : vector<2x8x1xf32> -> vector<2x8x1xf32>
    %40 = vector.broadcast %39 : vector<2x8x1xf32> to vector<2x8x8xf32>
    %41 = arith.mulf %36, %40 : vector<2x8x8xf32>
    %42 = arith.truncf %41 : vector<2x8x8xf32> to vector<2x8x8xbf16>
    %43 = vector.extract_strided_slice %25 {offsets = [0, 0, 0], sizes = [2, 8, 8], strides = [1, 1, 1]} : vector<2x8x32xbf16> to vector<2x8x8xbf16>
    "tpu.trace_start"() <{level = 10 : i32, message = "bqk,bkd->bqd"}> : () -> ()
    %cst_20 = arith.constant dense<0.000000e+00> : vector<2x8x8xf32>
    %44 = tpu.matmul %42, %43, %cst_20 {dimension_numbers = #tpu.dot_dimension_numbers<[2], [1], [1], [2], [0, 0, 0, 1, 1, 2], [0], [0]>} : vector<2x8x8xbf16>, vector<2x8x8xbf16>, vector<2x8x8xf32> -> vector<2x8x8xf32>
    "tpu.trace_stop"() : () -> ()
    %45 = vector.shape_cast %44 : vector<2x8x8xf32> to vector<16x8xf32>
    %46 = arith.truncf %45 : vector<16x8xf32> to vector<16x8xbf16>
    %c0_21 = arith.constant 0 : index
    %c0_22 = arith.constant 0 : index
    %47 = vector.load %arg6[%c0_21, %c0_22] : memref<32x32xbf16, #tpu.memory_space<vmem>>, vector<8x32xbf16>
    %cst_23 = arith.constant dense<0.000000e+00> : vector<16x32xf32>
    %48 = tpu.matmul %46, %47, %cst_23 {dimension_numbers = #tpu.dot_dimension_numbers<[1], [0], [0], [1], [0, 0, 1, 1], [], []>} : vector<16x8xbf16>, vector<8x32xbf16>, vector<16x32xf32> -> vector<16x32xf32>
    %49 = arith.addf %26, %48 : vector<16x32xf32>
    %50 = vector.extract_strided_slice %21 {offsets = [0, 0, 8], sizes = [2, 8, 8], strides = [1, 1, 1]} : vector<2x8x32xbf16> to vector<2x8x8xbf16>
    %51 = vector.extract_strided_slice %23 {offsets = [0, 0, 8], sizes = [2, 8, 8], strides = [1, 1, 1]} : vector<2x8x32xbf16> to vector<2x8x8xbf16>
    "tpu.trace_start"() <{level = 10 : i32, message = "bqd,bkd->bqk"}> : () -> ()
    %cst_24 = arith.constant dense<0.000000e+00> : vector<2x8x8xf32>
    %52 = tpu.matmul %50, %51, %cst_24 {dimension_numbers = #tpu.dot_dimension_numbers<[2], [2], [1], [1], [0, 0, 0, 1, 1, 1], [0], [0]>} : vector<2x8x8xbf16>, vector<2x8x8xbf16>, vector<2x8x8xf32> -> vector<2x8x8xf32>
    "tpu.trace_stop"() : () -> ()
    %53 = vector.broadcast %0 : vector<2x1x8xf32> to vector<2x8x8xf32>
    %54 = arith.addf %52, %53 : vector<2x8x8xf32>
    %cst_25 = arith.constant dense<0xFF800000> : vector<2x8xf32>
    %55 = vector.multi_reduction <maximumf>, %54, %cst_25 [2] : vector<2x8x8xf32> to vector<2x8xf32>
    %56 = vector.shape_cast %55 : vector<2x8xf32> to vector<2x8x1xf32>
    %57 = vector.broadcast %56 : vector<2x8x1xf32> to vector<2x8x8xf32>
    %58 = arith.subf %54, %57 : vector<2x8x8xf32>
    %59 = math.exp %58 : vector<2x8x8xf32>
    %cst_26 = arith.constant dense<0.000000e+00> : vector<2x8xf32>
    %60 = vector.multi_reduction <add>, %59, %cst_26 [2] : vector<2x8x8xf32> to vector<2x8xf32>
    %61 = vector.shape_cast %60 : vector<2x8xf32> to vector<2x8x1xf32>
    %62 = tpu.reciprocal %61 {approx = true} : vector<2x8x1xf32> -> vector<2x8x1xf32>
    %63 = vector.broadcast %62 : vector<2x8x1xf32> to vector<2x8x8xf32>
    %64 = arith.mulf %59, %63 : vector<2x8x8xf32>
    %65 = arith.truncf %64 : vector<2x8x8xf32> to vector<2x8x8xbf16>
    %66 = vector.extract_strided_slice %25 {offsets = [0, 0, 8], sizes = [2, 8, 8], strides = [1, 1, 1]} : vector<2x8x32xbf16> to vector<2x8x8xbf16>
    "tpu.trace_start"() <{level = 10 : i32, message = "bqk,bkd->bqd"}> : () -> ()
    %cst_27 = arith.constant dense<0.000000e+00> : vector<2x8x8xf32>
    %67 = tpu.matmul %65, %66, %cst_27 {dimension_numbers = #tpu.dot_dimension_numbers<[2], [1], [1], [2], [0, 0, 0, 1, 1, 2], [0], [0]>} : vector<2x8x8xbf16>, vector<2x8x8xbf16>, vector<2x8x8xf32> -> vector<2x8x8xf32>
    "tpu.trace_stop"() : () -> ()
    %68 = vector.shape_cast %67 : vector<2x8x8xf32> to vector<16x8xf32>
    %69 = arith.truncf %68 : vector<16x8xf32> to vector<16x8xbf16>
    %c8 = arith.constant 8 : index
    %c0_28 = arith.constant 0 : index
    %70 = vector.load %arg6[%c8, %c0_28] : memref<32x32xbf16, #tpu.memory_space<vmem>>, vector<8x32xbf16>
    %cst_29 = arith.constant dense<0.000000e+00> : vector<16x32xf32>
    %71 = tpu.matmul %69, %70, %cst_29 {dimension_numbers = #tpu.dot_dimension_numbers<[1], [0], [0], [1], [0, 0, 1, 1], [], []>} : vector<16x8xbf16>, vector<8x32xbf16>, vector<16x32xf32> -> vector<16x32xf32>
    %72 = arith.addf %49, %71 : vector<16x32xf32>
    %73 = vector.extract_strided_slice %21 {offsets = [0, 0, 16], sizes = [2, 8, 8], strides = [1, 1, 1]} : vector<2x8x32xbf16> to vector<2x8x8xbf16>
    %74 = vector.extract_strided_slice %23 {offsets = [0, 0, 16], sizes = [2, 8, 8], strides = [1, 1, 1]} : vector<2x8x32xbf16> to vector<2x8x8xbf16>
    "tpu.trace_start"() <{level = 10 : i32, message = "bqd,bkd->bqk"}> : () -> ()
    %cst_30 = arith.constant dense<0.000000e+00> : vector<2x8x8xf32>
    %75 = tpu.matmul %73, %74, %cst_30 {dimension_numbers = #tpu.dot_dimension_numbers<[2], [2], [1], [1], [0, 0, 0, 1, 1, 1], [0], [0]>} : vector<2x8x8xbf16>, vector<2x8x8xbf16>, vector<2x8x8xf32> -> vector<2x8x8xf32>
    "tpu.trace_stop"() : () -> ()
    %76 = vector.broadcast %0 : vector<2x1x8xf32> to vector<2x8x8xf32>
    %77 = arith.addf %75, %76 : vector<2x8x8xf32>
    %cst_31 = arith.constant dense<0xFF800000> : vector<2x8xf32>
    %78 = vector.multi_reduction <maximumf>, %77, %cst_31 [2] : vector<2x8x8xf32> to vector<2x8xf32>
    %79 = vector.shape_cast %78 : vector<2x8xf32> to vector<2x8x1xf32>
    %80 = vector.broadcast %79 : vector<2x8x1xf32> to vector<2x8x8xf32>
    %81 = arith.subf %77, %80 : vector<2x8x8xf32>
    %82 = math.exp %81 : vector<2x8x8xf32>
    %cst_32 = arith.constant dense<0.000000e+00> : vector<2x8xf32>
    %83 = vector.multi_reduction <add>, %82, %cst_32 [2] : vector<2x8x8xf32> to vector<2x8xf32>
    %84 = vector.shape_cast %83 : vector<2x8xf32> to vector<2x8x1xf32>
    %85 = tpu.reciprocal %84 {approx = true} : vector<2x8x1xf32> -> vector<2x8x1xf32>
    %86 = vector.broadcast %85 : vector<2x8x1xf32> to vector<2x8x8xf32>
    %87 = arith.mulf %82, %86 : vector<2x8x8xf32>
    %88 = arith.truncf %87 : vector<2x8x8xf32> to vector<2x8x8xbf16>
    %89 = vector.extract_strided_slice %25 {offsets = [0, 0, 16], sizes = [2, 8, 8], strides = [1, 1, 1]} : vector<2x8x32xbf16> to vector<2x8x8xbf16>
    "tpu.trace_start"() <{level = 10 : i32, message = "bqk,bkd->bqd"}> : () -> ()
    %cst_33 = arith.constant dense<0.000000e+00> : vector<2x8x8xf32>
    %90 = tpu.matmul %88, %89, %cst_33 {dimension_numbers = #tpu.dot_dimension_numbers<[2], [1], [1], [2], [0, 0, 0, 1, 1, 2], [0], [0]>} : vector<2x8x8xbf16>, vector<2x8x8xbf16>, vector<2x8x8xf32> -> vector<2x8x8xf32>
    "tpu.trace_stop"() : () -> ()
    %91 = vector.shape_cast %90 : vector<2x8x8xf32> to vector<16x8xf32>
    %92 = arith.truncf %91 : vector<16x8xf32> to vector<16x8xbf16>
    %c16 = arith.constant 16 : index
    %c0_34 = arith.constant 0 : index
    %93 = vector.load %arg6[%c16, %c0_34] : memref<32x32xbf16, #tpu.memory_space<vmem>>, vector<8x32xbf16>
    %cst_35 = arith.constant dense<0.000000e+00> : vector<16x32xf32>
    %94 = tpu.matmul %92, %93, %cst_35 {dimension_numbers = #tpu.dot_dimension_numbers<[1], [0], [0], [1], [0, 0, 1, 1], [], []>} : vector<16x8xbf16>, vector<8x32xbf16>, vector<16x32xf32> -> vector<16x32xf32>
    %95 = arith.addf %72, %94 : vector<16x32xf32>
    %96 = vector.extract_strided_slice %21 {offsets = [0, 0, 24], sizes = [2, 8, 8], strides = [1, 1, 1]} : vector<2x8x32xbf16> to vector<2x8x8xbf16>
    %97 = vector.extract_strided_slice %23 {offsets = [0, 0, 24], sizes = [2, 8, 8], strides = [1, 1, 1]} : vector<2x8x32xbf16> to vector<2x8x8xbf16>
    "tpu.trace_start"() <{level = 10 : i32, message = "bqd,bkd->bqk"}> : () -> ()
    %cst_36 = arith.constant dense<0.000000e+00> : vector<2x8x8xf32>
    %98 = tpu.matmul %96, %97, %cst_36 {dimension_numbers = #tpu.dot_dimension_numbers<[2], [2], [1], [1], [0, 0, 0, 1, 1, 1], [0], [0]>} : vector<2x8x8xbf16>, vector<2x8x8xbf16>, vector<2x8x8xf32> -> vector<2x8x8xf32>
    "tpu.trace_stop"() : () -> ()
    %99 = vector.broadcast %0 : vector<2x1x8xf32> to vector<2x8x8xf32>
    %100 = arith.addf %98, %99 : vector<2x8x8xf32>
    %cst_37 = arith.constant dense<0xFF800000> : vector<2x8xf32>
    %101 = vector.multi_reduction <maximumf>, %100, %cst_37 [2] : vector<2x8x8xf32> to vector<2x8xf32>
    %102 = vector.shape_cast %101 : vector<2x8xf32> to vector<2x8x1xf32>
    %103 = vector.broadcast %102 : vector<2x8x1xf32> to vector<2x8x8xf32>
    %104 = arith.subf %100, %103 : vector<2x8x8xf32>
    %105 = math.exp %104 : vector<2x8x8xf32>
    %cst_38 = arith.constant dense<0.000000e+00> : vector<2x8xf32>
    %106 = vector.multi_reduction <add>, %105, %cst_38 [2] : vector<2x8x8xf32> to vector<2x8xf32>
    %107 = vector.shape_cast %106 : vector<2x8xf32> to vector<2x8x1xf32>
    %108 = tpu.reciprocal %107 {approx = true} : vector<2x8x1xf32> -> vector<2x8x1xf32>
    %109 = vector.broadcast %108 : vector<2x8x1xf32> to vector<2x8x8xf32>
    %110 = arith.mulf %105, %109 : vector<2x8x8xf32>
    %111 = arith.truncf %110 : vector<2x8x8xf32> to vector<2x8x8xbf16>
    %112 = vector.extract_strided_slice %25 {offsets = [0, 0, 24], sizes = [2, 8, 8], strides = [1, 1, 1]} : vector<2x8x32xbf16> to vector<2x8x8xbf16>
    "tpu.trace_start"() <{level = 10 : i32, message = "bqk,bkd->bqd"}> : () -> ()
    %cst_39 = arith.constant dense<0.000000e+00> : vector<2x8x8xf32>
    %113 = tpu.matmul %111, %112, %cst_39 {dimension_numbers = #tpu.dot_dimension_numbers<[2], [1], [1], [2], [0, 0, 0, 1, 1, 2], [0], [0]>} : vector<2x8x8xbf16>, vector<2x8x8xbf16>, vector<2x8x8xf32> -> vector<2x8x8xf32>
    "tpu.trace_stop"() : () -> ()
    %114 = vector.shape_cast %113 : vector<2x8x8xf32> to vector<16x8xf32>
    %115 = arith.truncf %114 : vector<16x8xf32> to vector<16x8xbf16>
    %c24 = arith.constant 24 : index
    %c0_40 = arith.constant 0 : index
    %116 = vector.load %arg6[%c24, %c0_40] : memref<32x32xbf16, #tpu.memory_space<vmem>>, vector<8x32xbf16>
    %cst_41 = arith.constant dense<0.000000e+00> : vector<16x32xf32>
    %117 = tpu.matmul %115, %116, %cst_41 {dimension_numbers = #tpu.dot_dimension_numbers<[1], [0], [0], [1], [0, 0, 1, 1], [], []>} : vector<16x8xbf16>, vector<8x32xbf16>, vector<16x32xf32> -> vector<16x32xf32>
    %118 = arith.addf %95, %117 : vector<16x32xf32>
    %c3 = arith.constant 3 : index
    %c0_42 = arith.constant 0 : index
    %119 = vector.load %arg13[%c3, %c0_42] : memref<18x32xf32, #tpu.memory_space<vmem>>, vector<1x32xf32>
    %120 = vector.broadcast %119 : vector<1x32xf32> to vector<16x32xf32>
    %121 = arith.addf %118, %120 : vector<16x32xf32>
    %122 = arith.extf %1 : vector<16x32xbf16> to vector<16x32xf32>
    %123 = arith.addf %121, %122 : vector<16x32xf32>
    %cst_43 = arith.constant dense<0.000000e+00> : vector<16xf32>
    %124 = vector.multi_reduction <add>, %123, %cst_43 [1] : vector<16x32xf32> to vector<16xf32>
    %125 = vector.shape_cast %124 : vector<16xf32> to vector<16x1xf32>
    %cst_44 = arith.constant 3.200000e+01 : f32
    %126 = vector.broadcast %cst_44 : f32 to vector<16x1xf32>
    %127 = arith.divf %125, %126 : vector<16x1xf32>
    %128 = vector.broadcast %127 : vector<16x1xf32> to vector<16x32xf32>
    %129 = arith.subf %123, %128 : vector<16x32xf32>
    %130 = arith.mulf %129, %129 : vector<16x32xf32>
    %cst_45 = arith.constant dense<0.000000e+00> : vector<16xf32>
    %131 = vector.multi_reduction <add>, %130, %cst_45 [1] : vector<16x32xf32> to vector<16xf32>
    %132 = vector.shape_cast %131 : vector<16xf32> to vector<16x1xf32>
    %cst_46 = arith.constant 3.200000e+01 : f32
    %133 = vector.broadcast %cst_46 : f32 to vector<16x1xf32>
    %134 = arith.divf %132, %133 : vector<16x1xf32>
    %cst_47 = arith.constant 9.99999974E-6 : f32
    %135 = vector.broadcast %cst_47 : f32 to vector<16x1xf32>
    %136 = arith.addf %134, %135 : vector<16x1xf32>
    %137 = math.rsqrt %136 : vector<16x1xf32>
    %138 = vector.broadcast %137 : vector<16x1xf32> to vector<16x32xf32>
    %139 = arith.mulf %129, %138 : vector<16x32xf32>
    %c4 = arith.constant 4 : index
    %c0_48 = arith.constant 0 : index
    %140 = vector.load %arg13[%c4, %c0_48] : memref<18x32xf32, #tpu.memory_space<vmem>>, vector<1x32xf32>
    %141 = vector.broadcast %140 : vector<1x32xf32> to vector<16x32xf32>
    %142 = arith.mulf %139, %141 : vector<16x32xf32>
    %c5 = arith.constant 5 : index
    %c0_49 = arith.constant 0 : index
    %143 = vector.load %arg13[%c5, %c0_49] : memref<18x32xf32, #tpu.memory_space<vmem>>, vector<1x32xf32>
    %144 = vector.broadcast %143 : vector<1x32xf32> to vector<16x32xf32>
    %145 = arith.addf %142, %144 : vector<16x32xf32>
    %146 = arith.truncf %145 : vector<16x32xf32> to vector<16x32xbf16>
    %c0_50 = arith.constant 0 : index
    %c0_51 = arith.constant 0 : index
    %147 = vector.load %arg7[%c0_50, %c0_51] : memref<32x64xbf16, #tpu.memory_space<vmem>>, vector<32x64xbf16>
    %cst_52 = arith.constant dense<0.000000e+00> : vector<16x64xf32>
    %148 = tpu.matmul %146, %147, %cst_52 {dimension_numbers = #tpu.dot_dimension_numbers<[1], [0], [0], [1], [0, 0, 1, 1], [], []>} : vector<16x32xbf16>, vector<32x64xbf16>, vector<16x64xf32> -> vector<16x64xf32>
    %c0_53 = arith.constant 0 : index
    %c0_54 = arith.constant 0 : index
    %149 = vector.load %arg14[%c0_53, %c0_54] : memref<2x64xf32, #tpu.memory_space<vmem>>, vector<1x64xf32>
    %150 = vector.broadcast %149 : vector<1x64xf32> to vector<16x64xf32>
    %151 = arith.addf %148, %150 : vector<16x64xf32>
    %cst_55 = arith.constant 0.000000e+00 : f32
    %152 = vector.broadcast %cst_55 : f32 to vector<16x64xf32>
    %153 = arith.maximumf %151, %152 : vector<16x64xf32>
    %154 = arith.truncf %153 : vector<16x64xf32> to vector<16x64xbf16>
    %c0_56 = arith.constant 0 : index
    %c0_57 = arith.constant 0 : index
    %155 = vector.load %arg8[%c0_56, %c0_57] : memref<64x32xbf16, #tpu.memory_space<vmem>>, vector<64x32xbf16>
    %cst_58 = arith.constant dense<0.000000e+00> : vector<16x32xf32>
    %156 = tpu.matmul %154, %155, %cst_58 {dimension_numbers = #tpu.dot_dimension_numbers<[1], [0], [0], [1], [0, 0, 1, 1], [], []>} : vector<16x64xbf16>, vector<64x32xbf16>, vector<16x32xf32> -> vector<16x32xf32>
    %157 = arith.addf %145, %156 : vector<16x32xf32>
    %c6 = arith.constant 6 : index
    %c0_59 = arith.constant 0 : index
    %158 = vector.load %arg13[%c6, %c0_59] : memref<18x32xf32, #tpu.memory_space<vmem>>, vector<1x32xf32>
    %159 = vector.broadcast %158 : vector<1x32xf32> to vector<16x32xf32>
    %160 = arith.addf %157, %159 : vector<16x32xf32>
    %cst_60 = arith.constant dense<0.000000e+00> : vector<16xf32>
    %161 = vector.multi_reduction <add>, %160, %cst_60 [1] : vector<16x32xf32> to vector<16xf32>
    %162 = vector.shape_cast %161 : vector<16xf32> to vector<16x1xf32>
    %cst_61 = arith.constant 3.200000e+01 : f32
    %163 = vector.broadcast %cst_61 : f32 to vector<16x1xf32>
    %164 = arith.divf %162, %163 : vector<16x1xf32>
    %165 = vector.broadcast %164 : vector<16x1xf32> to vector<16x32xf32>
    %166 = arith.subf %160, %165 : vector<16x32xf32>
    %167 = arith.mulf %166, %166 : vector<16x32xf32>
    %cst_62 = arith.constant dense<0.000000e+00> : vector<16xf32>
    %168 = vector.multi_reduction <add>, %167, %cst_62 [1] : vector<16x32xf32> to vector<16xf32>
    %169 = vector.shape_cast %168 : vector<16xf32> to vector<16x1xf32>
    %cst_63 = arith.constant 3.200000e+01 : f32
    %170 = vector.broadcast %cst_63 : f32 to vector<16x1xf32>
    %171 = arith.divf %169, %170 : vector<16x1xf32>
    %cst_64 = arith.constant 9.99999974E-6 : f32
    %172 = vector.broadcast %cst_64 : f32 to vector<16x1xf32>
    %173 = arith.addf %171, %172 : vector<16x1xf32>
    %174 = math.rsqrt %173 : vector<16x1xf32>
    %175 = vector.broadcast %174 : vector<16x1xf32> to vector<16x32xf32>
    %176 = arith.mulf %166, %175 : vector<16x32xf32>
    %c7 = arith.constant 7 : index
    %c0_65 = arith.constant 0 : index
    %177 = vector.load %arg13[%c7, %c0_65] : memref<18x32xf32, #tpu.memory_space<vmem>>, vector<1x32xf32>
    %178 = vector.broadcast %177 : vector<1x32xf32> to vector<16x32xf32>
    %179 = arith.mulf %176, %178 : vector<16x32xf32>
    %c8_66 = arith.constant 8 : index
    %c0_67 = arith.constant 0 : index
    %180 = vector.load %arg13[%c8_66, %c0_67] : memref<18x32xf32, #tpu.memory_space<vmem>>, vector<1x32xf32>
    %181 = vector.broadcast %180 : vector<1x32xf32> to vector<16x32xf32>
    %182 = arith.addf %179, %181 : vector<16x32xf32>
    %183 = arith.truncf %182 : vector<16x32xf32> to vector<16x32xbf16>
    %c0_68 = arith.constant 0 : index
    %c0_69 = arith.constant 0 : index
    %184 = vector.load %arg9[%c0_68, %c0_69] : memref<32x96xbf16, #tpu.memory_space<vmem>>, vector<32x96xbf16>
    %cst_70 = arith.constant dense<0.000000e+00> : vector<16x96xf32>
    %185 = tpu.matmul %183, %184, %cst_70 {dimension_numbers = #tpu.dot_dimension_numbers<[1], [0], [0], [1], [0, 0, 1, 1], [], []>} : vector<16x32xbf16>, vector<32x96xbf16>, vector<16x96xf32> -> vector<16x96xf32>
    %186 = vector.extract_strided_slice %185 {offsets = [0, 0], sizes = [16, 32], strides = [1, 1]} : vector<16x96xf32> to vector<16x32xf32>
    %c9 = arith.constant 9 : index
    %c0_71 = arith.constant 0 : index
    %187 = vector.load %arg13[%c9, %c0_71] : memref<18x32xf32, #tpu.memory_space<vmem>>, vector<1x32xf32>
    %188 = vector.broadcast %187 : vector<1x32xf32> to vector<16x32xf32>
    %189 = arith.addf %186, %188 : vector<16x32xf32>
    %190 = vector.extract_strided_slice %185 {offsets = [0, 32], sizes = [16, 32], strides = [1, 1]} : vector<16x96xf32> to vector<16x32xf32>
    %c10 = arith.constant 10 : index
    %c0_72 = arith.constant 0 : index
    %191 = vector.load %arg13[%c10, %c0_72] : memref<18x32xf32, #tpu.memory_space<vmem>>, vector<1x32xf32>
    %192 = vector.broadcast %191 : vector<1x32xf32> to vector<16x32xf32>
    %193 = arith.addf %190, %192 : vector<16x32xf32>
    %194 = vector.extract_strided_slice %185 {offsets = [0, 64], sizes = [16, 32], strides = [1, 1]} : vector<16x96xf32> to vector<16x32xf32>
    %c11 = arith.constant 11 : index
    %c0_73 = arith.constant 0 : index
    %195 = vector.load %arg13[%c11, %c0_73] : memref<18x32xf32, #tpu.memory_space<vmem>>, vector<1x32xf32>
    %196 = vector.broadcast %195 : vector<1x32xf32> to vector<16x32xf32>
    %197 = arith.addf %194, %196 : vector<16x32xf32>
    %cst_74 = arith.constant 0.353553385 : f32
    %198 = vector.broadcast %cst_74 : f32 to vector<16x32xf32>
    %199 = arith.mulf %189, %198 : vector<16x32xf32>
    %200 = vector.shape_cast %199 : vector<16x32xf32> to vector<2x8x32xf32>
    %201 = arith.truncf %200 : vector<2x8x32xf32> to vector<2x8x32xbf16>
    %202 = vector.shape_cast %193 : vector<16x32xf32> to vector<2x8x32xf32>
    %203 = arith.truncf %202 : vector<2x8x32xf32> to vector<2x8x32xbf16>
    %204 = vector.shape_cast %197 : vector<16x32xf32> to vector<2x8x32xf32>
    %205 = arith.truncf %204 : vector<2x8x32xf32> to vector<2x8x32xbf16>
    %cst_75 = arith.constant 0.000000e+00 : f32
    %206 = vector.broadcast %cst_75 : f32 to vector<16x32xf32>
    %207 = vector.extract_strided_slice %201 {offsets = [0, 0, 0], sizes = [2, 8, 8], strides = [1, 1, 1]} : vector<2x8x32xbf16> to vector<2x8x8xbf16>
    %208 = vector.extract_strided_slice %203 {offsets = [0, 0, 0], sizes = [2, 8, 8], strides = [1, 1, 1]} : vector<2x8x32xbf16> to vector<2x8x8xbf16>
    "tpu.trace_start"() <{level = 10 : i32, message = "bqd,bkd->bqk"}> : () -> ()
    %cst_76 = arith.constant dense<0.000000e+00> : vector<2x8x8xf32>
    %209 = tpu.matmul %207, %208, %cst_76 {dimension_numbers = #tpu.dot_dimension_numbers<[2], [2], [1], [1], [0, 0, 0, 1, 1, 1], [0], [0]>} : vector<2x8x8xbf16>, vector<2x8x8xbf16>, vector<2x8x8xf32> -> vector<2x8x8xf32>
    "tpu.trace_stop"() : () -> ()
    %cst_77 = arith.constant dense<0xFF800000> : vector<2x8xf32>
    %210 = vector.multi_reduction <maximumf>, %209, %cst_77 [2] : vector<2x8x8xf32> to vector<2x8xf32>
    %211 = vector.shape_cast %210 : vector<2x8xf32> to vector<2x8x1xf32>
    %212 = vector.broadcast %211 : vector<2x8x1xf32> to vector<2x8x8xf32>
    %213 = arith.subf %209, %212 : vector<2x8x8xf32>
    %214 = math.exp %213 : vector<2x8x8xf32>
    %cst_78 = arith.constant dense<0.000000e+00> : vector<2x8xf32>
    %215 = vector.multi_reduction <add>, %214, %cst_78 [2] : vector<2x8x8xf32> to vector<2x8xf32>
    %216 = vector.shape_cast %215 : vector<2x8xf32> to vector<2x8x1xf32>
    %217 = tpu.reciprocal %216 {approx = true} : vector<2x8x1xf32> -> vector<2x8x1xf32>
    %218 = vector.broadcast %217 : vector<2x8x1xf32> to vector<2x8x8xf32>
    %219 = arith.mulf %214, %218 : vector<2x8x8xf32>
    %220 = arith.truncf %219 : vector<2x8x8xf32> to vector<2x8x8xbf16>
    %221 = vector.extract_strided_slice %205 {offsets = [0, 0, 0], sizes = [2, 8, 8], strides = [1, 1, 1]} : vector<2x8x32xbf16> to vector<2x8x8xbf16>
    "tpu.trace_start"() <{level = 10 : i32, message = "bqk,bkd->bqd"}> : () -> ()
    %cst_79 = arith.constant dense<0.000000e+00> : vector<2x8x8xf32>
    %222 = tpu.matmul %220, %221, %cst_79 {dimension_numbers = #tpu.dot_dimension_numbers<[2], [1], [1], [2], [0, 0, 0, 1, 1, 2], [0], [0]>} : vector<2x8x8xbf16>, vector<2x8x8xbf16>, vector<2x8x8xf32> -> vector<2x8x8xf32>
    "tpu.trace_stop"() : () -> ()
    %223 = vector.shape_cast %222 : vector<2x8x8xf32> to vector<16x8xf32>
    %224 = arith.truncf %223 : vector<16x8xf32> to vector<16x8xbf16>
    %c0_80 = arith.constant 0 : index
    %c0_81 = arith.constant 0 : index
    %225 = vector.load %arg10[%c0_80, %c0_81] : memref<32x32xbf16, #tpu.memory_space<vmem>>, vector<8x32xbf16>
    %cst_82 = arith.constant dense<0.000000e+00> : vector<16x32xf32>
    %226 = tpu.matmul %224, %225, %cst_82 {dimension_numbers = #tpu.dot_dimension_numbers<[1], [0], [0], [1], [0, 0, 1, 1], [], []>} : vector<16x8xbf16>, vector<8x32xbf16>, vector<16x32xf32> -> vector<16x32xf32>
    %227 = arith.addf %206, %226 : vector<16x32xf32>
    %228 = vector.extract_strided_slice %201 {offsets = [0, 0, 8], sizes = [2, 8, 8], strides = [1, 1, 1]} : vector<2x8x32xbf16> to vector<2x8x8xbf16>
    %229 = vector.extract_strided_slice %203 {offsets = [0, 0, 8], sizes = [2, 8, 8], strides = [1, 1, 1]} : vector<2x8x32xbf16> to vector<2x8x8xbf16>
    "tpu.trace_start"() <{level = 10 : i32, message = "bqd,bkd->bqk"}> : () -> ()
    %cst_83 = arith.constant dense<0.000000e+00> : vector<2x8x8xf32>
    %230 = tpu.matmul %228, %229, %cst_83 {dimension_numbers = #tpu.dot_dimension_numbers<[2], [2], [1], [1], [0, 0, 0, 1, 1, 1], [0], [0]>} : vector<2x8x8xbf16>, vector<2x8x8xbf16>, vector<2x8x8xf32> -> vector<2x8x8xf32>
    "tpu.trace_stop"() : () -> ()
    %cst_84 = arith.constant dense<0xFF800000> : vector<2x8xf32>
    %231 = vector.multi_reduction <maximumf>, %230, %cst_84 [2] : vector<2x8x8xf32> to vector<2x8xf32>
    %232 = vector.shape_cast %231 : vector<2x8xf32> to vector<2x8x1xf32>
    %233 = vector.broadcast %232 : vector<2x8x1xf32> to vector<2x8x8xf32>
    %234 = arith.subf %230, %233 : vector<2x8x8xf32>
    %235 = math.exp %234 : vector<2x8x8xf32>
    %cst_85 = arith.constant dense<0.000000e+00> : vector<2x8xf32>
    %236 = vector.multi_reduction <add>, %235, %cst_85 [2] : vector<2x8x8xf32> to vector<2x8xf32>
    %237 = vector.shape_cast %236 : vector<2x8xf32> to vector<2x8x1xf32>
    %238 = tpu.reciprocal %237 {approx = true} : vector<2x8x1xf32> -> vector<2x8x1xf32>
    %239 = vector.broadcast %238 : vector<2x8x1xf32> to vector<2x8x8xf32>
    %240 = arith.mulf %235, %239 : vector<2x8x8xf32>
    %241 = arith.truncf %240 : vector<2x8x8xf32> to vector<2x8x8xbf16>
    %242 = vector.extract_strided_slice %205 {offsets = [0, 0, 8], sizes = [2, 8, 8], strides = [1, 1, 1]} : vector<2x8x32xbf16> to vector<2x8x8xbf16>
    "tpu.trace_start"() <{level = 10 : i32, message = "bqk,bkd->bqd"}> : () -> ()
    %cst_86 = arith.constant dense<0.000000e+00> : vector<2x8x8xf32>
    %243 = tpu.matmul %241, %242, %cst_86 {dimension_numbers = #tpu.dot_dimension_numbers<[2], [1], [1], [2], [0, 0, 0, 1, 1, 2], [0], [0]>} : vector<2x8x8xbf16>, vector<2x8x8xbf16>, vector<2x8x8xf32> -> vector<2x8x8xf32>
    "tpu.trace_stop"() : () -> ()
    %244 = vector.shape_cast %243 : vector<2x8x8xf32> to vector<16x8xf32>
    %245 = arith.truncf %244 : vector<16x8xf32> to vector<16x8xbf16>
    %c8_87 = arith.constant 8 : index
    %c0_88 = arith.constant 0 : index
    %246 = vector.load %arg10[%c8_87, %c0_88] : memref<32x32xbf16, #tpu.memory_space<vmem>>, vector<8x32xbf16>
    %cst_89 = arith.constant dense<0.000000e+00> : vector<16x32xf32>
    %247 = tpu.matmul %245, %246, %cst_89 {dimension_numbers = #tpu.dot_dimension_numbers<[1], [0], [0], [1], [0, 0, 1, 1], [], []>} : vector<16x8xbf16>, vector<8x32xbf16>, vector<16x32xf32> -> vector<16x32xf32>
    %248 = arith.addf %227, %247 : vector<16x32xf32>
    %249 = vector.extract_strided_slice %201 {offsets = [0, 0, 16], sizes = [2, 8, 8], strides = [1, 1, 1]} : vector<2x8x32xbf16> to vector<2x8x8xbf16>
    %250 = vector.extract_strided_slice %203 {offsets = [0, 0, 16], sizes = [2, 8, 8], strides = [1, 1, 1]} : vector<2x8x32xbf16> to vector<2x8x8xbf16>
    "tpu.trace_start"() <{level = 10 : i32, message = "bqd,bkd->bqk"}> : () -> ()
    %cst_90 = arith.constant dense<0.000000e+00> : vector<2x8x8xf32>
    %251 = tpu.matmul %249, %250, %cst_90 {dimension_numbers = #tpu.dot_dimension_numbers<[2], [2], [1], [1], [0, 0, 0, 1, 1, 1], [0], [0]>} : vector<2x8x8xbf16>, vector<2x8x8xbf16>, vector<2x8x8xf32> -> vector<2x8x8xf32>
    "tpu.trace_stop"() : () -> ()
    %cst_91 = arith.constant dense<0xFF800000> : vector<2x8xf32>
    %252 = vector.multi_reduction <maximumf>, %251, %cst_91 [2] : vector<2x8x8xf32> to vector<2x8xf32>
    %253 = vector.shape_cast %252 : vector<2x8xf32> to vector<2x8x1xf32>
    %254 = vector.broadcast %253 : vector<2x8x1xf32> to vector<2x8x8xf32>
    %255 = arith.subf %251, %254 : vector<2x8x8xf32>
    %256 = math.exp %255 : vector<2x8x8xf32>
    %cst_92 = arith.constant dense<0.000000e+00> : vector<2x8xf32>
    %257 = vector.multi_reduction <add>, %256, %cst_92 [2] : vector<2x8x8xf32> to vector<2x8xf32>
    %258 = vector.shape_cast %257 : vector<2x8xf32> to vector<2x8x1xf32>
    %259 = tpu.reciprocal %258 {approx = true} : vector<2x8x1xf32> -> vector<2x8x1xf32>
    %260 = vector.broadcast %259 : vector<2x8x1xf32> to vector<2x8x8xf32>
    %261 = arith.mulf %256, %260 : vector<2x8x8xf32>
    %262 = arith.truncf %261 : vector<2x8x8xf32> to vector<2x8x8xbf16>
    %263 = vector.extract_strided_slice %205 {offsets = [0, 0, 16], sizes = [2, 8, 8], strides = [1, 1, 1]} : vector<2x8x32xbf16> to vector<2x8x8xbf16>
    "tpu.trace_start"() <{level = 10 : i32, message = "bqk,bkd->bqd"}> : () -> ()
    %cst_93 = arith.constant dense<0.000000e+00> : vector<2x8x8xf32>
    %264 = tpu.matmul %262, %263, %cst_93 {dimension_numbers = #tpu.dot_dimension_numbers<[2], [1], [1], [2], [0, 0, 0, 1, 1, 2], [0], [0]>} : vector<2x8x8xbf16>, vector<2x8x8xbf16>, vector<2x8x8xf32> -> vector<2x8x8xf32>
    "tpu.trace_stop"() : () -> ()
    %265 = vector.shape_cast %264 : vector<2x8x8xf32> to vector<16x8xf32>
    %266 = arith.truncf %265 : vector<16x8xf32> to vector<16x8xbf16>
    %c16_94 = arith.constant 16 : index
    %c0_95 = arith.constant 0 : index
    %267 = vector.load %arg10[%c16_94, %c0_95] : memref<32x32xbf16, #tpu.memory_space<vmem>>, vector<8x32xbf16>
    %cst_96 = arith.constant dense<0.000000e+00> : vector<16x32xf32>
    %268 = tpu.matmul %266, %267, %cst_96 {dimension_numbers = #tpu.dot_dimension_numbers<[1], [0], [0], [1], [0, 0, 1, 1], [], []>} : vector<16x8xbf16>, vector<8x32xbf16>, vector<16x32xf32> -> vector<16x32xf32>
    %269 = arith.addf %248, %268 : vector<16x32xf32>
    %270 = vector.extract_strided_slice %201 {offsets = [0, 0, 24], sizes = [2, 8, 8], strides = [1, 1, 1]} : vector<2x8x32xbf16> to vector<2x8x8xbf16>
    %271 = vector.extract_strided_slice %203 {offsets = [0, 0, 24], sizes = [2, 8, 8], strides = [1, 1, 1]} : vector<2x8x32xbf16> to vector<2x8x8xbf16>
    "tpu.trace_start"() <{level = 10 : i32, message = "bqd,bkd->bqk"}> : () -> ()
    %cst_97 = arith.constant dense<0.000000e+00> : vector<2x8x8xf32>
    %272 = tpu.matmul %270, %271, %cst_97 {dimension_numbers = #tpu.dot_dimension_numbers<[2], [2], [1], [1], [0, 0, 0, 1, 1, 1], [0], [0]>} : vector<2x8x8xbf16>, vector<2x8x8xbf16>, vector<2x8x8xf32> -> vector<2x8x8xf32>
    "tpu.trace_stop"() : () -> ()
    %cst_98 = arith.constant dense<0xFF800000> : vector<2x8xf32>
    %273 = vector.multi_reduction <maximumf>, %272, %cst_98 [2] : vector<2x8x8xf32> to vector<2x8xf32>
    %274 = vector.shape_cast %273 : vector<2x8xf32> to vector<2x8x1xf32>
    %275 = vector.broadcast %274 : vector<2x8x1xf32> to vector<2x8x8xf32>
    %276 = arith.subf %272, %275 : vector<2x8x8xf32>
    %277 = math.exp %276 : vector<2x8x8xf32>
    %cst_99 = arith.constant dense<0.000000e+00> : vector<2x8xf32>
    %278 = vector.multi_reduction <add>, %277, %cst_99 [2] : vector<2x8x8xf32> to vector<2x8xf32>
    %279 = vector.shape_cast %278 : vector<2x8xf32> to vector<2x8x1xf32>
    %280 = tpu.reciprocal %279 {approx = true} : vector<2x8x1xf32> -> vector<2x8x1xf32>
    %281 = vector.broadcast %280 : vector<2x8x1xf32> to vector<2x8x8xf32>
    %282 = arith.mulf %277, %281 : vector<2x8x8xf32>
    %283 = arith.truncf %282 : vector<2x8x8xf32> to vector<2x8x8xbf16>
    %284 = vector.extract_strided_slice %205 {offsets = [0, 0, 24], sizes = [2, 8, 8], strides = [1, 1, 1]} : vector<2x8x32xbf16> to vector<2x8x8xbf16>
    "tpu.trace_start"() <{level = 10 : i32, message = "bqk,bkd->bqd"}> : () -> ()
    %cst_100 = arith.constant dense<0.000000e+00> : vector<2x8x8xf32>
    %285 = tpu.matmul %283, %284, %cst_100 {dimension_numbers = #tpu.dot_dimension_numbers<[2], [1], [1], [2], [0, 0, 0, 1, 1, 2], [0], [0]>} : vector<2x8x8xbf16>, vector<2x8x8xbf16>, vector<2x8x8xf32> -> vector<2x8x8xf32>
    "tpu.trace_stop"() : () -> ()
    %286 = vector.shape_cast %285 : vector<2x8x8xf32> to vector<16x8xf32>
    %287 = arith.truncf %286 : vector<16x8xf32> to vector<16x8xbf16>
    %c24_101 = arith.constant 24 : index
    %c0_102 = arith.constant 0 : index
    %288 = vector.load %arg10[%c24_101, %c0_102] : memref<32x32xbf16, #tpu.memory_space<vmem>>, vector<8x32xbf16>
    %cst_103 = arith.constant dense<0.000000e+00> : vector<16x32xf32>
    %289 = tpu.matmul %287, %288, %cst_103 {dimension_numbers = #tpu.dot_dimension_numbers<[1], [0], [0], [1], [0, 0, 1, 1], [], []>} : vector<16x8xbf16>, vector<8x32xbf16>, vector<16x32xf32> -> vector<16x32xf32>
    %290 = arith.addf %269, %289 : vector<16x32xf32>
    %c12 = arith.constant 12 : index
    %c0_104 = arith.constant 0 : index
    %291 = vector.load %arg13[%c12, %c0_104] : memref<18x32xf32, #tpu.memory_space<vmem>>, vector<1x32xf32>
    %292 = vector.broadcast %291 : vector<1x32xf32> to vector<16x32xf32>
    %293 = arith.addf %290, %292 : vector<16x32xf32>
    %294 = arith.addf %293, %182 : vector<16x32xf32>
    %cst_105 = arith.constant dense<0.000000e+00> : vector<16xf32>
    %295 = vector.multi_reduction <add>, %294, %cst_105 [1] : vector<16x32xf32> to vector<16xf32>
    %296 = vector.shape_cast %295 : vector<16xf32> to vector<16x1xf32>
    %cst_106 = arith.constant 3.200000e+01 : f32
    %297 = vector.broadcast %cst_106 : f32 to vector<16x1xf32>
    %298 = arith.divf %296, %297 : vector<16x1xf32>
    %299 = vector.broadcast %298 : vector<16x1xf32> to vector<16x32xf32>
    %300 = arith.subf %294, %299 : vector<16x32xf32>
    %301 = arith.mulf %300, %300 : vector<16x32xf32>
    %cst_107 = arith.constant dense<0.000000e+00> : vector<16xf32>
    %302 = vector.multi_reduction <add>, %301, %cst_107 [1] : vector<16x32xf32> to vector<16xf32>
    %303 = vector.shape_cast %302 : vector<16xf32> to vector<16x1xf32>
    %cst_108 = arith.constant 3.200000e+01 : f32
    %304 = vector.broadcast %cst_108 : f32 to vector<16x1xf32>
    %305 = arith.divf %303, %304 : vector<16x1xf32>
    %cst_109 = arith.constant 9.99999974E-6 : f32
    %306 = vector.broadcast %cst_109 : f32 to vector<16x1xf32>
    %307 = arith.addf %305, %306 : vector<16x1xf32>
    %308 = math.rsqrt %307 : vector<16x1xf32>
    %309 = vector.broadcast %308 : vector<16x1xf32> to vector<16x32xf32>
    %310 = arith.mulf %300, %309 : vector<16x32xf32>
    %c13 = arith.constant 13 : index
    %c0_110 = arith.constant 0 : index
    %311 = vector.load %arg13[%c13, %c0_110] : memref<18x32xf32, #tpu.memory_space<vmem>>, vector<1x32xf32>
    %312 = vector.broadcast %311 : vector<1x32xf32> to vector<16x32xf32>
    %313 = arith.mulf %310, %312 : vector<16x32xf32>
    %c14 = arith.constant 14 : index
    %c0_111 = arith.constant 0 : index
    %314 = vector.load %arg13[%c14, %c0_111] : memref<18x32xf32, #tpu.memory_space<vmem>>, vector<1x32xf32>
    %315 = vector.broadcast %314 : vector<1x32xf32> to vector<16x32xf32>
    %316 = arith.addf %313, %315 : vector<16x32xf32>
    %317 = arith.truncf %316 : vector<16x32xf32> to vector<16x32xbf16>
    %c0_112 = arith.constant 0 : index
    %c0_113 = arith.constant 0 : index
    %318 = vector.load %arg11[%c0_112, %c0_113] : memref<32x64xbf16, #tpu.memory_space<vmem>>, vector<32x64xbf16>
    %cst_114 = arith.constant dense<0.000000e+00> : vector<16x64xf32>
    %319 = tpu.matmul %317, %318, %cst_114 {dimension_numbers = #tpu.dot_dimension_numbers<[1], [0], [0], [1], [0, 0, 1, 1], [], []>} : vector<16x32xbf16>, vector<32x64xbf16>, vector<16x64xf32> -> vector<16x64xf32>
    %c1_115 = arith.constant 1 : index
    %c0_116 = arith.constant 0 : index
    %320 = vector.load %arg14[%c1_115, %c0_116] : memref<2x64xf32, #tpu.memory_space<vmem>>, vector<1x64xf32>
    %321 = vector.broadcast %320 : vector<1x64xf32> to vector<16x64xf32>
    %322 = arith.addf %319, %321 : vector<16x64xf32>
    %cst_117 = arith.constant 0.000000e+00 : f32
    %323 = vector.broadcast %cst_117 : f32 to vector<16x64xf32>
    %324 = arith.maximumf %322, %323 : vector<16x64xf32>
    %325 = arith.truncf %324 : vector<16x64xf32> to vector<16x64xbf16>
    %c0_118 = arith.constant 0 : index
    %c0_119 = arith.constant 0 : index
    %326 = vector.load %arg12[%c0_118, %c0_119] : memref<64x32xbf16, #tpu.memory_space<vmem>>, vector<64x32xbf16>
    %cst_120 = arith.constant dense<0.000000e+00> : vector<16x32xf32>
    %327 = tpu.matmul %325, %326, %cst_120 {dimension_numbers = #tpu.dot_dimension_numbers<[1], [0], [0], [1], [0, 0, 1, 1], [], []>} : vector<16x64xbf16>, vector<64x32xbf16>, vector<16x32xf32> -> vector<16x32xf32>
    %328 = arith.addf %316, %327 : vector<16x32xf32>
    %c15 = arith.constant 15 : index
    %c0_121 = arith.constant 0 : index
    %329 = vector.load %arg13[%c15, %c0_121] : memref<18x32xf32, #tpu.memory_space<vmem>>, vector<1x32xf32>
    %330 = vector.broadcast %329 : vector<1x32xf32> to vector<16x32xf32>
    %331 = arith.addf %328, %330 : vector<16x32xf32>
    %cst_122 = arith.constant dense<0.000000e+00> : vector<16xf32>
    %332 = vector.multi_reduction <add>, %331, %cst_122 [1] : vector<16x32xf32> to vector<16xf32>
    %333 = vector.shape_cast %332 : vector<16xf32> to vector<16x1xf32>
    %cst_123 = arith.constant 3.200000e+01 : f32
    %334 = vector.broadcast %cst_123 : f32 to vector<16x1xf32>
    %335 = arith.divf %333, %334 : vector<16x1xf32>
    %336 = vector.broadcast %335 : vector<16x1xf32> to vector<16x32xf32>
    %337 = arith.subf %331, %336 : vector<16x32xf32>
    %338 = arith.mulf %337, %337 : vector<16x32xf32>
    %cst_124 = arith.constant dense<0.000000e+00> : vector<16xf32>
    %339 = vector.multi_reduction <add>, %338, %cst_124 [1] : vector<16x32xf32> to vector<16xf32>
    %340 = vector.shape_cast %339 : vector<16xf32> to vector<16x1xf32>
    %cst_125 = arith.constant 3.200000e+01 : f32
    %341 = vector.broadcast %cst_125 : f32 to vector<16x1xf32>
    %342 = arith.divf %340, %341 : vector<16x1xf32>
    %cst_126 = arith.constant 9.99999974E-6 : f32
    %343 = vector.broadcast %cst_126 : f32 to vector<16x1xf32>
    %344 = arith.addf %342, %343 : vector<16x1xf32>
    %345 = math.rsqrt %344 : vector<16x1xf32>
    %346 = vector.broadcast %345 : vector<16x1xf32> to vector<16x32xf32>
    %347 = arith.mulf %337, %346 : vector<16x32xf32>
    %c16_127 = arith.constant 16 : index
    %c0_128 = arith.constant 0 : index
    %348 = vector.load %arg13[%c16_127, %c0_128] : memref<18x32xf32, #tpu.memory_space<vmem>>, vector<1x32xf32>
    %349 = vector.broadcast %348 : vector<1x32xf32> to vector<16x32xf32>
    %350 = arith.mulf %347, %349 : vector<16x32xf32>
    %c17 = arith.constant 17 : index
    %c0_129 = arith.constant 0 : index
    %351 = vector.load %arg13[%c17, %c0_129] : memref<18x32xf32, #tpu.memory_space<vmem>>, vector<1x32xf32>
    %352 = vector.broadcast %351 : vector<1x32xf32> to vector<16x32xf32>
    %353 = arith.addf %350, %352 : vector<16x32xf32>
    %c0_130 = arith.constant 0 : index
    %c0_131 = arith.constant 0 : index
    %354 = vector.load %arg15[%c0_130, %c0_131] : memref<16x32xf32, #tpu.memory_space<vmem>>, vector<16x32xf32>
    tpu.vector_store %arg15[%c0_130, %c0_131], %353 {strides = array<i32>} : memref<16x32xf32, #tpu.memory_space<vmem>>, vector<16x32xf32>,
    return
  }
  func.func @transform_0(%arg0: i32) -> (i32, i32) {
    %c0_i32 = arith.constant 0 : i32
    %c0_i32_0 = arith.constant 0 : i32
    return %arg0, %c0_i32 : i32, i32
  }
  func.func @transform_1(%arg0: i32) -> (i32, i32) {
    %c0_i32 = arith.constant 0 : i32
    %c0_i32_0 = arith.constant 0 : i32
    return %arg0, %c0_i32 : i32, i32
  }
  func.func @transform_2(%arg0: i32) -> (i32, i32, i32) {
    %c0_i32 = arith.constant 0 : i32
    %c0_i32_0 = arith.constant 0 : i32
    %c0_i32_1 = arith.constant 0 : i32
    return %arg0, %c0_i32, %c0_i32_0 : i32, i32, i32
  }
  func.func @transform_3(%arg0: i32) -> (i32, i32) {
    %c0_i32 = arith.constant 0 : i32
    %c0_i32_0 = arith.constant 0 : i32
    %c0_i32_1 = arith.constant 0 : i32
    return %c0_i32, %c0_i32_0 : i32, i32
  }
  func.func @transform_4(%arg0: i32) -> (i32, i32) {
    %c0_i32 = arith.constant 0 : i32
    %c0_i32_0 = arith.constant 0 : i32
    %c0_i32_1 = arith.constant 0 : i32
    return %c0_i32, %c0_i32_0 : i32, i32
  }
  func.func @transform_5(%arg0: i32) -> (i32, i32) {
    %c0_i32 = arith.constant 0 : i32
    %c0_i32_0 = arith.constant 0 : i32
    %c0_i32_1 = arith.constant 0 : i32
    return %c0_i32, %c0_i32_0 : i32, i32
  }
  func.func @transform_6(%arg0: i32) -> (i32, i32) {
    %c0_i32 = arith.constant 0 : i32
    %c0_i32_0 = arith.constant 0 : i32
    %c0_i32_1 = arith.constant 0 : i32
    return %c0_i32, %c0_i32_0 : i32, i32
  }
  func.func @transform_7(%arg0: i32) -> (i32, i32) {
    %c0_i32 = arith.constant 0 : i32
    %c0_i32_0 = arith.constant 0 : i32
    %c0_i32_1 = arith.constant 0 : i32
    return %c0_i32, %c0_i32_0 : i32, i32
  }
  func.func @transform_8(%arg0: i32) -> (i32, i32) {
    %c0_i32 = arith.constant 0 : i32
    %c0_i32_0 = arith.constant 0 : i32
    %c0_i32_1 = arith.constant 0 : i32
    return %c0_i32, %c0_i32_0 : i32, i32
  }
  func.func @transform_9(%arg0: i32) -> (i32, i32) {
    %c0_i32 = arith.constant 0 : i32
    %c0_i32_0 = arith.constant 0 : i32
    %c0_i32_1 = arith.constant 0 : i32
    return %c0_i32, %c0_i32_0 : i32, i32
  }
  func.func @transform_10(%arg0: i32) -> (i32, i32) {
    %c0_i32 = arith.constant 0 : i32
    %c0_i32_0 = arith.constant 0 : i32
    %c0_i32_1 = arith.constant 0 : i32
    return %c0_i32, %c0_i32_0 : i32, i32
  }
  func.func @transform_11(%arg0: i32) -> (i32, i32) {
    %c0_i32 = arith.constant 0 : i32
    %c0_i32_0 = arith.constant 0 : i32
    %c0_i32_1 = arith.constant 0 : i32
    return %c0_i32, %c0_i32_0 : i32, i32
  }
  func.func @transform_12(%arg0: i32) -> (i32, i32) {
    %c0_i32 = arith.constant 0 : i32
    %c0_i32_0 = arith.constant 0 : i32
    %c0_i32_1 = arith.constant 0 : i32
    return %c0_i32, %c0_i32_0 : i32, i32
  }
  func.func @transform_13(%arg0: i32) -> (i32, i32) {
    %c0_i32 = arith.constant 0 : i32
    %c0_i32_0 = arith.constant 0 : i32
    %c0_i32_1 = arith.constant 0 : i32
    return %c0_i32, %c0_i32_0 : i32, i32
  }
  func.func @transform_14(%arg0: i32) -> (i32, i32) {
    %c0_i32 = arith.constant 0 : i32
    %c0_i32_0 = arith.constant 0 : i32
    return %arg0, %c0_i32 : i32, i32
  }
}

</mosaic_0001>

<bundles_post_ra>
// kernel: single_ccab_forward.1
= control target key start
LH: loop header
LB: loop body
LE: loop exit
PB: predicated region body
PF: predicated region fallthrough
CT: control target
= control target key end

     0   :  { %v3585_v0 = vmov 0.0   ;;  %vm3586_vm0 = vmmov 0   ;;  %vm138_vm1 = vcmask 130048   ;;  %vm80_vm2 = vcmask 261120   ;;  %s3588_s30 = smov 96   ;;  %s3590_s15 = smov 88   ;;  %s4291_s3 = inlined_call_operand.vmem [shape: bf16[32,32], index: 3, kind: input, shape index: {}]   ;;  %s4292_s4 = inlined_call_operand.vmem [shape: bf16[16,64], index: 4, kind: input, shape index: {}]   ;;  %s4293_s1 = inlined_call_operand.vmem [shape: bf16[16,16], index: 1, kind: input, shape index: {}]   ;;  %s4294_s0 = inlined_call_operand.vmem [shape: bf16[16,32], index: 0, kind: input, shape index: {}]   ;;  %s4295_s12 = inlined_call_operand.vmem [shape: f32[18,32], index: 12, kind: input, shape index: {}]   ;;  %s4296_s2 = inlined_call_operand.vmem [shape: f32[2,1,8], index: 2, kind: input, shape index: {}]   ;;  %s4297_s5 = inlined_call_operand.vmem [shape: bf16[32,32], index: 5, kind: input, shape index: {}]   ;;  %s4298_s6 = inlined_call_operand.vmem [shape: bf16[32,64], index: 6, kind: input, shape index: {}]   ;;  %s4299_s7 = inlined_call_operand.vmem [shape: bf16[64,32], index: 7, kind: input, shape index: {}]   ;;  %s4300_s13 = inlined_call_operand.vmem [shape: f32[2,64], index: 13, kind: input, shape index: {}]   ;;  %s4301_s8 = inlined_call_operand.vmem [shape: bf16[32,96], index: 8, kind: input, shape index: {}]   ;;  %s4302_s9 = inlined_call_operand.vmem [shape: bf16[32,32], index: 9, kind: input, shape index: {}]   ;;  %s4303_s10 = inlined_call_operand.vmem [shape: bf16[32,64], index: 10, kind: input, shape index: {}]   ;;  %s4304_s11 = inlined_call_operand.vmem [shape: bf16[64,32], index: 11, kind: input, shape index: {}]   ;;  %s4305_s14 = inlined_call_operand.vmem [shape: f32[16,32], index: 14, kind: output, shape index: {}]  }
   0x1   :  { %3169 = vmatprep.subr.bf16.mxu0 %v3585_v0  ;;  %3177 = vmatprep.subr.bf16.mxu1 %v3585_v0  ;;  %v3485_v1 = vld [vmem:[%s4291_s3 + $0x8] sm:$0xff]   ;;  %v3486_v2 = vld [vmem:[%s4292_s4] sm:$0xff]   ;;  %vm221_vm3 = vcmask 64512   ;;  %vm344_vm4 = vcmask 1043456   ;;  %s3591_s16 = smov 112   ;;  %s3592_s4 = smov 80  }
   0x2   :  { %3179 = vmatprep.mubr.msk.bf16.mxu1 %vm3586_vm0, %v3585_v0  ;;  %3173 = vmatprep.mubr.msk.bf16.mxu0 %vm3586_vm0, %v3585_v0  ;;  %v3487_v3 = vld [vmem:[%s4293_s1] sm:$0xff]   ;;  %s3587_s1 = smov 32   ;;  %s3593_s21 = smov 104   ;;  %vm1454_vm5 = vcmask 523264  }
   0x3   :  { %3170 = vmatpush3.bf16.msra.mxu0 %v3485_v1  ;;  %3178 = vmatpush3.bf16.msra.mxu1 %v3486_v2  ;;  %v3488_v4 = vld [vmem:[%s4291_s3] sm:$0xff]   ;;  %s3595_s26 = smov 64   ;;  %s3597_s28 = smov 48  }
   0x4   :  { %3171 = vmatprep.subr.bf16.mxu0 %v3585_v0  ;;  %v3696_v5 = vld [vmem:[%s4294_s0] sm:$0xff]   ;;  %3183 = vmatprep.subr.bf16.mxu1 %v3585_v0  ;;  %s3594_s0 = smov 72  }
   0x5   :  { %v2986_v6 = vld [vmem:[%s4295_s12 + $0x2] ss:$0 sm:$0xff]  ;;  %v2985_v7 = vld [vmem:[%s4295_s12 + $0x1] ss:$0 sm:$0xff]  ;;  %v2977_v10 = vld [vmem:[%s4295_s12] ss:$0 sm:$0xff] }
   0x6   :  { %196 = vrot.lane.b32.xlu1 %v2986_v6, %s3587_s1  ;;  %3180 = vmatmul.mubr.msk.bf16.vlgmr.msra.gmra.mxu1 %vm138_vm1, %v3487_v3  ;;  %v3741_v29 = vld [vmem:[%s4296_s2] ss:$0 sm:$0xff]  ;;  %v3748_v36 = vld [vmem:[%s4296_s2 + $0x1] ss:$0 sm:$0xff]  ;;  %s3589_s2 = smov 120  }
   0x7   :  { %3172 = vmatpush3.bf16.msra.mxu0 %v3488_v4  ;;  %3185 = vmatprep.mubr.msk.bf16.mxu1 %vm3586_vm0, %v3585_v0 }
   0x8   :  { %3201 = vmatprep.subr.bf16.mxu0 %v3585_v0 }
   0xa   :  { %3174 = vmatmul.mubr.msk.bf16.vlgmr.msra.gmra.mxu0 %vm80_vm2, %v3696_v5 }
   0xb   :  { %3203 = vmatprep.mubr.msk.bf16.mxu0 %vm3586_vm0, %v3585_v0 }
  0x78   :  { %v197_v43 = vpop.permute.xlu1 %196 }
  0xc6   :  { %v176_v8 = vpop.f32.mrf.mxu1 }
  0xc7   :  { %v188_v9 = vadd.f32 %v2985_v7, %v176_v8  ;;  %v199_v44 = vadd.f32 %v197_v43, %v176_v8 }
  0xc8   :  { %v3181_v11 = vpop.f32.mrf.mxu1 }
  0xc9   :  { %v3716_v12 = vpack.c.bf16 %v188_v9, %v188_v9  ;;  %v3752_v45 = vpack.c.bf16 %v199_v44, %v199_v44 }
  0xca   :  { %v118_v13 = vpop.f32.mrf.mxu0  ;;  %v179_v15 = vpop.f32.mrf.mxu1 }
  0xcb   :  { %v119_v14 = vadd.f32 %v2977_v10, %v118_v13  ;;  %v189_v16 = vadd.f32 %v2985_v7, %v179_v15  ;;  %v226_v18 = vsel %vm221_vm3, %v3716_v12, 0  ;;  %v200_v46 = vadd.f32 %v197_v43, %v179_v15 }
  0xcc   :  { %v3175_v17 = vpop.f32.mrf.mxu0  ;;  %v3182_v20 = vpop.f32.mrf.mxu1  ;;  %3184 = vmatpush3.bf16.xpose.msra.mxu1 %v226_v18 }
  0xcd   :  { %v201_v19 = vmul.f32 0.35355338, %v119_v14  ;;  %3189 = vmatprep.subr.bf16.mxu1 %v3585_v0  ;;  %v3723_v23 = vpack.c.bf16 %v189_v16, %v189_v16  ;;  %v3756_v47 = vpack.c.bf16 %v200_v46, %v200_v46 }
  0xce   :  { %v121_v21 = vpop.f32.mrf.mxu0 }
  0xcf   :  { %v3721_v22 = vpack.c.bf16 %v201_v19, %v201_v19  ;;  %v122_v25 = vadd.f32 %v2977_v10, %v121_v21  ;;  %v272_v26 = vsel %vm221_vm3, %v3723_v23, 0 }
  0xd0   :  { %v3176_v24 = vpop.f32.mrf.mxu0 }
  0xd1   :  { %v202_v27 = vmul.f32 0.35355338, %v122_v25 }
  0xd3   :  { %3186 = vmatmul.mubr.msk.bf16.vlgmr.msra.gmra.mxu1 %vm221_vm3, %v3721_v22  ;;  %v3732_v28 = vpack.c.bf16 %v202_v27, %v202_v27 }
  0xd4   :  { %3190 = vmatpush3.bf16.xpose.msra.mxu1 %v272_v26  ;;  %3191 = vmatprep.mubr.msk.bf16.mxu1 %vm3586_vm0, %v3585_v0 }
  0xd5   :  { %3195 = vmatprep.subr.bf16.mxu1 %v3585_v0 }
  0xdb   :  { %3192 = vmatmul.mubr.msk.bf16.vlgmr.msra.gmra.mxu1 %vm221_vm3, %v3732_v28 }
  0xdc   :  { %3197 = vmatprep.mubr.msk.bf16.mxu1 %vm3586_vm0, %v3585_v0 }
 0x193   :  { %v262_v30 = vpop.f32.mrf.mxu1 }
 0x194   :  { %v263_v31 = vadd.f32 %v3741_v29, %v262_v30 }
 0x195   :  { %v3187_v32 = vpop.f32.mrf.mxu1 }
 0x196   :  { %v314_v33 = vsel %vm221_vm3, %v263_v31, -inf }
 0x197   :  { %315 = vmax.xlane.f32.xlu0 %v314_v33  ;;  %v265_v34 = vpop.f32.mrf.mxu1 }
 0x199   :  { %v3188_v35 = vpop.f32.mrf.mxu1 }
 0x19b   :  { %v308_v37 = vpop.f32.mrf.mxu1 }
 0x19c   :  { %v309_v38 = vadd.f32 %v3748_v36, %v308_v37 }
 0x19d   :  { %v3193_v39 = vpop.f32.mrf.mxu1 }
 0x19e   :  { %v317_v40 = vsel %vm221_vm3, %v309_v38, -inf }
 0x19f   :  { %318 = vmax.xlane.f32.xlu0 %v317_v40  ;;  %v311_v41 = vpop.f32.mrf.mxu1 }
 0x1a1   :  { %v3194_v42 = vpop.f32.mrf.mxu1 }
 0x1b5   :  { %339 = vrot.lane.b32.xlu0 %v3752_v45, %s3588_s30 }
 0x1b9   :  { %389 = vrot.lane.b32.xlu0 %v3756_v47, %s3588_s30 }
 0x220   :  { %v316_v48 = vpop.xlane.xlu0 %315 }
 0x221   :  { %v320_v49 = vsub.f32 %v263_v31, %v316_v48 }
 0x223   :  { %v322_v50 = vmul.f32 1.442695, %v320_v49 }
 0x225   :  { %3505 = vpow2.f32 %v322_v50 }
 0x228   :  { %v319_v51 = vpop.xlane.xlu0 %318 }
 0x229   :  { %v321_v52 = vsub.f32 %v309_v38, %v319_v51 }
 0x22b   :  { %v324_v53 = vmul.f32 1.442695, %v321_v52 }
 0x22c   :  { %v340_v54 = vpop.permute.xlu0 %339 }
 0x22d   :  { %3507 = vpow2.f32 %v324_v53  ;;  %v346_v55 = vsel %vm344_vm4, %v340_v54, 0 }
 0x22e   :  { %3196 = vmatpush3.bf16.msra.mxu1 %v346_v55 }
 0x22f   :  { %3207 = vmatprep.subr.bf16.mxu1 %v3585_v0 }
 0x230   :  { %v390_v56 = vpop.permute.xlu0 %389 }
 0x231   :  { %v395_v57 = vsel %vm344_vm4, %v390_v56, 0 }
 0x232   :  { %v3506_v58 = vpop.eup %3505  ;;  %3202 = vmatpush3.bf16.msra.mxu0 %v395_v57 }
 0x233   :  { %v326_v59 = vsel %vm221_vm3, %v3506_v58, 0.0  ;;  %3213 = vmatprep.subr.bf16.mxu0 %v3585_v0 }
 0x234   :  { %327 = vadd.xlane.f32.xlu1 %v326_v59 }
 0x23a   :  { %v3508_v60 = vpop.eup %3507 }
 0x23b   :  { %v329_v61 = vsel %vm221_vm3, %v3508_v60, 0.0 }
 0x23c   :  { %330 = vadd.xlane.f32.xlu0 %v329_v61 }
 0x245   :  { %495 = vrot.lane.b32.xlu1 %v3723_v23, %s3589_s2 }
 0x252   :  { %443 = vrot.lane.b32.xlu0 %v3716_v12, %s3589_s2 }
 0x256   :  { %440 = vrot.lane.b32.xlu0 %v3721_v22, %s3589_s2 }
 0x25a   :  { %492 = vrot.lane.b32.xlu0 %v3732_v28, %s3589_s2 }
 0x2bd   :  { %v328_v62 = vpop.xlane.xlu1 %327 }
 0x2be   :  { %3509 = vrcp.f32 %v328_v62 }
 0x2c1   :  { %v496_v9 = vpop.permute.xlu1 %495 }
 0x2c2   :  { %v501_v13 = vsel %vm221_vm3, %v496_v9, 0 }
 0x2c5   :  { %v331_v63 = vpop.xlane.xlu0 %330 }
 0x2c6   :  { %3511 = vrcp.f32 %v331_v63  ;;  %v438_v63 = vld [vmem:[%s4297_s5] sm:$0xf] }
 0x2c9   :  { %v444_v3 = vpop.permute.xlu0 %443 }
 0x2ca   :  { %v449_v6 = vsel %vm221_vm3, %v444_v3, 0  ;;  %v716_v3 = vsel %vm344_vm4, %v438_v63, 0 }
 0x2cb   :  { %v3510_v1 = vpop.eup %3509 }
 0x2cc   :  { %v334_v2 = vmul.f32 %v3510_v1, %v3506_v58 }
 0x2cd   :  { %v441_v11 = vpop.permute.xlu0 %440 }
 0x2ce   :  { %v336_v4 = vpack.c.bf16 %v334_v2, %v334_v2 }
 0x2d0   :  { %3198 = vmatmul.mubr.msk.bf16.vlgmr.msra.gmra.mxu1 %vm221_vm3, %v336_v4 }
 0x2d1   :  { %3208 = vmatpush3.bf16.xpose.msra.mxu1 %v449_v6  ;;  %3209 = vmatprep.mubr.msk.bf16.mxu1 %vm3586_vm0, %v3585_v0  ;;  %v493_v14 = vpop.permute.xlu0 %492 }
 0x2d2   :  { %3219 = vmatprep.subr.bf16.mxu1 %v3585_v0 }
 0x2d3   :  { %v3512_v7 = vpop.eup %3511 }
 0x2d4   :  { %v335_v8 = vmul.f32 %v3512_v7, %v3508_v60 }
 0x2d6   :  { %v337_v10 = vpack.c.bf16 %v335_v8, %v335_v8  ;;  %v664_v8 = vld [vmem:[%s4297_s5 + $0x4] sm:$0xf] }
 0x2d7   :  { %v669_v9 = vsel %vm344_vm4, %v664_v8, 0 }
 0x2d8   :  { %3204 = vmatmul.mubr.msk.bf16.vlgmr.msra.gmra.mxu0 %vm221_vm3, %v337_v10  ;;  %3210 = vmatmul.mubr.msk.bf16.vlgmr.msra.gmra.mxu1 %vm221_vm3, %v441_v11 }
 0x2d9   :  { %3214 = vmatpush3.bf16.xpose.msra.mxu0 %v501_v13  ;;  %3215 = vmatprep.mubr.msk.bf16.mxu0 %vm3586_vm0, %v3585_v0 }
 0x2da   :  { %3225 = vmatprep.subr.bf16.mxu0 %v3585_v0  ;;  %3221 = vmatprep.mubr.msk.bf16.mxu1 %vm3586_vm0, %v3585_v0 }
 0x2e0   :  { %3216 = vmatmul.mubr.msk.bf16.vlgmr.msra.gmra.mxu0 %vm221_vm3, %v493_v14 }
 0x2e1   :  { %3227 = vmatprep.mubr.msk.bf16.mxu0 %vm3586_vm0, %v3585_v0 }
 0x390   :  { %v3790_v15 = vpop.f32.mrf.mxu1 }
 0x392   :  { %v3199_v16 = vpop.f32.mrf.mxu1 }
 0x394   :  { %v385_v17 = vpop.f32.mrf.mxu1 }
 0x396   :  { %v3200_v18 = vpop.f32.mrf.mxu1 }
 0x398   :  { %v3792_v19 = vpop.f32.mrf.mxu0  ;;  %v485_v20 = vpop.f32.mrf.mxu1 }
 0x399   :  { %v437_v21 = vpack.c.bf16 %v3792_v19, %v3790_v15  ;;  %v486_v24 = vadd.f32 %v3741_v29, %v485_v20 }
 0x39a   :  { %v3205_v25 = vpop.f32.mrf.mxu0  ;;  %v3211_v26 = vpop.f32.mrf.mxu1 }
 0x39b   :  { %v543_v27 = vsel %vm221_vm3, %v486_v24, -inf }
 0x39c   :  { %544 = vmax.xlane.f32.xlu0 %v543_v27  ;;  %v434_v30 = vpop.f32.mrf.mxu0  ;;  %v488_v31 = vpop.f32.mrf.mxu1 }
 0x39e   :  { %v3206_v32 = vpop.f32.mrf.mxu0  ;;  %v3212_v33 = vpop.f32.mrf.mxu1 }
 0x3a0   :  { %v537_v34 = vpop.f32.mrf.mxu0 }
 0x3a1   :  { %v538_v35 = vadd.f32 %v3748_v36, %v537_v34 }
 0x3a2   :  { %v3217_v37 = vpop.f32.mrf.mxu0 }
 0x3a3   :  { %v546_v38 = vsel %vm221_vm3, %v538_v35, -inf }
 0x3a4   :  { %547 = vmax.xlane.f32.xlu1 %v546_v38  ;;  %v540_v39 = vpop.f32.mrf.mxu0 }
 0x3a6   :  { %v3218_v40 = vpop.f32.mrf.mxu0 }
 0x3b5   :  { %615 = vrot.lane.b32.xlu1 %v3756_v47, %s3590_s15 }
 0x3b9   :  { %761 = vrot.lane.b32.xlu1 %v3716_v12, %s3591_s16 }
 0x3bd   :  { %759 = vrot.lane.b32.xlu1 %v3721_v22, %s3591_s16 }
 0x425   :  { %v545_v41 = vpop.xlane.xlu0 %544 }
 0x426   :  { %v549_v42 = vsub.f32 %v486_v24, %v545_v41 }
 0x428   :  { %v551_v43 = vmul.f32 1.442695, %v549_v42 }
 0x42a   :  { %3513 = vpow2.f32 %v551_v43 }
 0x42d   :  { %v548_v44 = vpop.xlane.xlu1 %547 }
 0x42e   :  { %v550_v46 = vsub.f32 %v538_v35, %v548_v44 }
 0x430   :  { %v553_v48 = vmul.f32 1.442695, %v550_v46 }
 0x431   :  { %v616_v49 = vpop.permute.xlu1 %615 }
 0x432   :  { %3515 = vpow2.f32 %v553_v48  ;;  %v621_v50 = vsel %vm344_vm4, %v616_v49, 0 }
 0x433   :  { %3226 = vmatpush3.bf16.msra.mxu0 %v621_v50 }
 0x434   :  { %3237 = vmatprep.subr.bf16.mxu0 %v3585_v0 }
 0x435   :  { %v762_v15 = vpop.permute.xlu1 %761 }
 0x436   :  { %v767_v19 = vsel %vm221_vm3, %v762_v15, 0 }
 0x437   :  { %v3514_v51 = vpop.eup %3513 }
 0x438   :  { %v555_v52 = vsel %vm221_vm3, %v3514_v51, 0.0 }
 0x439   :  { %556 = vadd.xlane.f32.xlu0 %v555_v52  ;;  %v760_v25 = vpop.permute.xlu1 %759 }
 0x43f   :  { %v3516_v53 = vpop.eup %3515 }
 0x440   :  { %v558_v54 = vsel %vm221_vm3, %v3516_v53, 0.0 }
 0x441   :  { %559 = vadd.xlane.f32.xlu0 %v558_v54 }
 0x457   :  { %567 = vrot.lane.b32.xlu0 %v3752_v45, %s3590_s15 }
 0x45b   :  { %811 = vrot.lane.b32.xlu0 %v3723_v23, %s3591_s16 }
 0x45f   :  { %809 = vrot.lane.b32.xlu0 %v3732_v28, %s3591_s16 }
 0x4c2   :  { %v557_v55 = vpop.xlane.xlu0 %556 }
 0x4c3   :  { %3517 = vrcp.f32 %v557_v55 }
 0x4ca   :  { %v560_v56 = vpop.xlane.xlu0 %559 }
 0x4cb   :  { %3519 = vrcp.f32 %v560_v56 }
 0x4ce   :  { %v568_v57 = vpop.permute.xlu0 %567 }
 0x4cf   :  { %v573_v58 = vsel %vm344_vm4, %v568_v57, 0 }
 0x4d0   :  { %v3518_v59 = vpop.eup %3517  ;;  %3220 = vmatpush3.bf16.msra.mxu1 %v573_v58 }
 0x4d1   :  { %v563_v60 = vmul.f32 %v3518_v59, %v3514_v51  ;;  %3231 = vmatprep.subr.bf16.mxu1 %v3585_v0 }
 0x4d2   :  { %v812_v4 = vpop.permute.xlu0 %811 }
 0x4d3   :  { %v565_v61 = vpack.c.bf16 %v563_v60, %v563_v60  ;;  %v817_v6 = vsel %vm221_vm3, %v812_v4, 0 }
 0x4d5   :  { %3222 = vmatmul.mubr.msk.bf16.vlgmr.msra.gmra.mxu1 %vm221_vm3, %v565_v61 }
 0x4d6   :  { %3233 = vmatprep.mubr.msk.bf16.mxu1 %vm3586_vm0, %v3585_v0  ;;  %v810_v7 = vpop.permute.xlu0 %809  ;;  %3232 = vmatpush3.bf16.msra.mxu1 %v669_v9 }
 0x4d7   :  { %3243 = vmatprep.subr.bf16.mxu1 %v3585_v0 }
 0x4d8   :  { %v3520_v62 = vpop.eup %3519 }
 0x4d9   :  { %v564_v1 = vmul.f32 %v3520_v62, %v3516_v53 }
 0x4db   :  { %v566_v2 = vpack.c.bf16 %v564_v1, %v564_v1 }
 0x4dd   :  { %3228 = vmatmul.mubr.msk.bf16.vlgmr.msra.gmra.mxu0 %vm221_vm3, %v566_v2 }
 0x4de   :  { %3238 = vmatpush3.bf16.msra.mxu0 %v716_v3  ;;  %3239 = vmatprep.mubr.msk.bf16.mxu0 %vm3586_vm0, %v3585_v0 }
 0x4df   :  { %3249 = vmatprep.subr.bf16.mxu0 %v3585_v0 }
 0x4e5   :  { %3240 = vmatmul.mubr.msk.bf16.vlgmr.msra.gmra.mxu0 %vm221_vm3, %v437_v21 }
 0x4e6   :  { %3250 = vmatpush3.bf16.xpose.msra.mxu0 %v817_v6  ;;  %3251 = vmatprep.mubr.msk.bf16.mxu0 %vm3586_vm0, %v3585_v0 }
 0x4e7   :  { %3261 = vmatprep.subr.bf16.mxu0 %v3585_v0 }
 0x4ed   :  { %3252 = vmatmul.mubr.msk.bf16.vlgmr.msra.gmra.mxu0 %vm221_vm3, %v810_v7 }
 0x4ee   :  { %3263 = vmatprep.mubr.msk.bf16.mxu0 %vm3586_vm0, %v3585_v0 }
 0x595   :  { %v609_v10 = vpop.f32.mrf.mxu1 }
 0x597   :  { %v3223_v11 = vpop.f32.mrf.mxu1 }
 0x599   :  { %v612_v13 = vpop.f32.mrf.mxu1 }
 0x59b   :  { %v3224_v14 = vpop.f32.mrf.mxu1 }
 0x59d   :  { %v657_v16 = vpop.f32.mrf.mxu0 }
 0x59e   :  { %v663_v17 = vpack.c.bf16 %v657_v16, %v609_v10  ;;  %v980_v10 = vld [vmem:[%s4297_s5 + $0x8] sm:$0xf] }
 0x59f   :  { %v3229_v18 = vpop.f32.mrf.mxu0  ;;  %v985_v11 = vsel %vm344_vm4, %v980_v10, 0 }
 0x5a0   :  { %3234 = vmatmul.mubr.msk.bf16.vlgmr.msra.gmra.mxu1 %vm221_vm3, %v663_v17 }
 0x5a1   :  { %3244 = vmatpush3.bf16.xpose.msra.mxu1 %v767_v19  ;;  %v660_v20 = vpop.f32.mrf.mxu0  ;;  %3245 = vmatprep.mubr.msk.bf16.mxu1 %vm3586_vm0, %v3585_v0 }
 0x5a2   :  { %3255 = vmatprep.subr.bf16.mxu1 %v3585_v0 }
 0x5a3   :  { %v3230_v21 = vpop.f32.mrf.mxu0 }
 0x5a5   :  { %v3850_v24 = vpop.f32.mrf.mxu0 }
 0x5a7   :  { %v3241_v26 = vpop.f32.mrf.mxu0 }
 0x5a8   :  { %3246 = vmatmul.mubr.msk.bf16.vlgmr.msra.gmra.mxu1 %vm221_vm3, %v760_v25 }
 0x5a9   :  { %v3853_v27 = vpop.f32.mrf.mxu0  ;;  %3257 = vmatprep.mubr.msk.bf16.mxu1 %vm3586_vm0, %v3585_v0 }
 0x5ab   :  { %v3242_v30 = vpop.f32.mrf.mxu0 }
 0x5ad   :  { %v853_v31 = vpop.f32.mrf.mxu0 }
 0x5ae   :  { %v854_v32 = vadd.f32 %v3748_v36, %v853_v31 }
 0x5af   :  { %v3253_v33 = vpop.f32.mrf.mxu0 }
 0x5b0   :  { %v862_v34 = vsel %vm221_vm3, %v854_v32, -inf }
 0x5b1   :  { %863 = vmax.xlane.f32.xlu0 %v862_v34  ;;  %v856_v35 = vpop.f32.mrf.mxu0 }
 0x5b3   :  { %v3254_v37 = vpop.f32.mrf.mxu0 }
 0x63a   :  { %v864_v38 = vpop.xlane.xlu0 %863 }
 0x63b   :  { %v866_v39 = vsub.f32 %v854_v32, %v864_v38 }
 0x63d   :  { %v869_v40 = vmul.f32 1.442695, %v866_v39 }
 0x63f   :  { %3521 = vpow2.f32 %v869_v40 }
 0x64c   :  { %v3522_v41 = vpop.eup %3521 }
 0x64d   :  { %v874_v42 = vsel %vm221_vm3, %v3522_v41, 0.0 }
 0x64e   :  { %875 = vadd.xlane.f32.xlu0 %v874_v42 }
 0x660   :  { %v3860_v43 = vpop.f32.mrf.mxu1 }
 0x662   :  { %v3235_v44 = vpop.f32.mrf.mxu1 }
 0x664   :  { %v3862_v46 = vpop.f32.mrf.mxu1 }
 0x666   :  { %v3236_v48 = vpop.f32.mrf.mxu1 }
 0x668   :  { %v803_v49 = vpop.f32.mrf.mxu1 }
 0x669   :  { %v804_v50 = vadd.f32 %v3741_v29, %v803_v49  ;;  %v756_v49 = vadd.f32 %v3853_v27, %v3862_v46 }
 0x66a   :  { %v3247_v51 = vpop.f32.mrf.mxu1 }
 0x66b   :  { %v859_v52 = vsel %vm221_vm3, %v804_v50, -inf }
 0x66c   :  { %860 = vmax.xlane.f32.xlu1 %v859_v52  ;;  %v806_v53 = vpop.f32.mrf.mxu1 }
 0x66e   :  { %v3248_v54 = vpop.f32.mrf.mxu1 }
 0x67d   :  { %883 = vrot.lane.b32.xlu1 %v3752_v45, %s3592_s4 }
 0x681   :  { %1032 = vrot.lane.b32.xlu1 %v3716_v12, %s3593_s21 }
 0x685   :  { %1082 = vrot.lane.b32.xlu1 %v3723_v23, %s3593_s21 }
 0x689   :  { %1030 = vrot.lane.b32.xlu1 %v3721_v22, %s3593_s21 }
 0x6d7   :  { %v876_v12 = vpop.xlane.xlu0 %875 }
 0x6f5   :  { %v861_v55 = vpop.xlane.xlu1 %860 }
 0x6f6   :  { %v865_v56 = vsub.f32 %v804_v50, %v861_v55 }
 0x6f8   :  { %v867_v57 = vmul.f32 1.442695, %v865_v56 }
 0x6f9   :  { %v884_v58 = vpop.permute.xlu1 %883 }
 0x6fa   :  { %3523 = vpow2.f32 %v867_v57  ;;  %v889_v59 = vsel %vm344_vm4, %v884_v58, 0 }
 0x6fb   :  { %3256 = vmatpush3.bf16.msra.mxu1 %v889_v59  ;;  %3525 = vrcp.f32 %v876_v12 }
 0x6fc   :  { %3267 = vmatprep.subr.bf16.mxu1 %v3585_v0 }
 0x6fd   :  { %v1033_v63 = vpop.permute.xlu1 %1032 }
 0x6fe   :  { %v1038_v4 = vsel %vm221_vm3, %v1033_v63, 0 }
 0x701   :  { %v1083_v6 = vpop.permute.xlu1 %1082 }
 0x702   :  { %v1088_v31 = vsel %vm221_vm3, %v1083_v6, 0 }
 0x705   :  { %v1031_v8 = vpop.permute.xlu1 %1030 }
 0x707   :  { %v3524_v60 = vpop.eup %3523 }
 0x708   :  { %v871_v61 = vsel %vm221_vm3, %v3524_v60, 0.0  ;;  %v3526_v22 = vpop.eup %3525 }
 0x709   :  { %872 = vadd.xlane.f32.xlu0 %v871_v61  ;;  %v880_v62 = vmul.f32 %v3526_v22, %v3522_v41  ;;  %v753_v41 = vadd.f32 %v3850_v24, %v3860_v43 }
 0x70b   :  { %v882_v3 = vpack.c.bf16 %v880_v62, %v880_v62 }
 0x71f   :  { %931 = vrot.lane.b32.xlu0 %v3756_v47, %s3592_s4 }
 0x723   :  { %1080 = vrot.lane.b32.xlu0 %v3732_v28, %s3593_s21 }
 0x792   :  { %v873_v23 = vpop.xlane.xlu0 %872 }
 0x793   :  { %3527 = vrcp.f32 %v873_v23  ;;  %v1251_v23 = vld [vmem:[%s4297_s5 + $0xc] sm:$0xf] }
 0x794   :  { %v1256_v62 = vsel %vm344_vm4, %v1251_v23, 0  ;;  %v3494_v23 = vld [vmem:[%s4299_s7 + $0x8] sm:$0xff]  }
 0x796   :  { %v932_v1 = vpop.permute.xlu0 %931 }
 0x797   :  { %v937_v2 = vsel %vm344_vm4, %v932_v1, 0 }
 0x798   :  { %3262 = vmatpush3.bf16.msra.mxu0 %v937_v2 }
 0x799   :  { %3273 = vmatprep.subr.bf16.mxu0 %v3585_v0 }
 0x79a   :  { %v1081_v34 = vpop.permute.xlu0 %1080 }
 0x79b   :  { %3264 = vmatmul.mubr.msk.bf16.vlgmr.msra.gmra.mxu0 %vm221_vm3, %v882_v3 }
 0x79c   :  { %3274 = vmatpush3.bf16.xpose.msra.mxu0 %v1038_v4  ;;  %3275 = vmatprep.mubr.msk.bf16.mxu0 %vm3586_vm0, %v3585_v0 }
 0x79d   :  { %3285 = vmatprep.subr.bf16.mxu0 %v3585_v0 }
 0x7a0   :  { %v3528_v28 = vpop.eup %3527 }
 0x7a1   :  { %v879_v7 = vmul.f32 %v3528_v28, %v3524_v60 }
 0x7a3   :  { %3276 = vmatmul.mubr.msk.bf16.vlgmr.msra.gmra.mxu0 %vm221_vm3, %v1031_v8  ;;  %v881_v9 = vpack.c.bf16 %v879_v7, %v879_v7 }
 0x7a4   :  { %3287 = vmatprep.mubr.msk.bf16.mxu0 %vm3586_vm0, %v3585_v0 }
 0x7a5   :  { %3258 = vmatmul.mubr.msk.bf16.vlgmr.msra.gmra.mxu1 %vm221_vm3, %v881_v9 }
 0x7a6   :  { %3269 = vmatprep.mubr.msk.bf16.mxu1 %vm3586_vm0, %v3585_v0  ;;  %3268 = vmatpush3.bf16.msra.mxu1 %v985_v11 }
 0x7a7   :  { %3279 = vmatprep.subr.bf16.mxu1 %v3585_v0 }
 0x85b   :  { %v973_v13 = vpop.f32.mrf.mxu0 }
 0x85d   :  { %v3265_v14 = vpop.f32.mrf.mxu0 }
 0x85f   :  { %v976_v15 = vpop.f32.mrf.mxu0 }
 0x861   :  { %v3266_v16 = vpop.f32.mrf.mxu0 }
 0x862   :  { %v3009_v16 = vld [vmem:[%s4295_s12 + $0x3] ss:$0 sm:$0xff] }
 0x863   :  { %v1074_v17 = vpop.f32.mrf.mxu0 }
 0x864   :  { %v1075_v18 = vadd.f32 %v3741_v29, %v1074_v17 }
 0x865   :  { %v925_v19 = vpop.f32.mrf.mxu1  ;;  %v3277_v20 = vpop.f32.mrf.mxu0 }
 0x866   :  { %v979_v21 = vpack.c.bf16 %v973_v13, %v925_v19  ;;  %v1130_v25 = vsel %vm221_vm3, %v1075_v18, -inf }
 0x867   :  { %v3259_v26 = vpop.f32.mrf.mxu1  ;;  %1131 = vmax.xlane.f32.xlu1 %v1130_v25  ;;  %v1077_v30 = vpop.f32.mrf.mxu0 }
 0x868   :  { %3270 = vmatmul.mubr.msk.bf16.vlgmr.msra.gmra.mxu1 %vm221_vm3, %v979_v21  ;;  %v1309_v30 = vunpack.c.h.bf16 %v3696_v5 }
 0x869   :  { %3280 = vmatpush3.bf16.xpose.msra.mxu1 %v1088_v31  ;;  %v928_v32 = vpop.f32.mrf.mxu1  ;;  %v3278_v33 = vpop.f32.mrf.mxu0  ;;  %3281 = vmatprep.mubr.msk.bf16.mxu1 %vm3586_vm0, %v3585_v0 }
 0x86a   :  { %3291 = vmatprep.subr.bf16.mxu1 %v3585_v0 }
 0x86b   :  { %v3260_v29 = vpop.f32.mrf.mxu1 }
 0x870   :  { %3282 = vmatmul.mubr.msk.bf16.vlgmr.msra.gmra.mxu1 %vm221_vm3, %v1081_v34 }
 0x871   :  { %3293 = vmatprep.mubr.msk.bf16.mxu1 %vm3586_vm0, %v3585_v0 }
 0x878   :  { %1154 = vrot.lane.b32.xlu1 %v3752_v45, %s3594_s0 }
 0x8f0   :  { %v1132_v35 = vpop.xlane.xlu1 %1131 }
 0x8f1   :  { %v1136_v39 = vsub.f32 %v1075_v18, %v1132_v35  ;;  %v1308_v18 = vunpack.c.l.bf16 %v3696_v5 }
 0x8f3   :  { %v1138_v40 = vmul.f32 1.442695, %v1136_v39 }
 0x8f4   :  { %v1155_v37 = vpop.permute.xlu1 %1154 }
 0x8f5   :  { %v1160_v38 = vsel %vm344_vm4, %v1155_v37, 0  ;;  %3529 = vpow2.f32 %v1138_v40 }
 0x8f6   :  { %3286 = vmatpush3.bf16.msra.mxu0 %v1160_v38 }
 0x8f7   :  { %3297 = vmatprep.subr.bf16.mxu0 %v3585_v0 }
 0x902   :  { %v3530_v56 = vpop.eup %3529 }
 0x903   :  { %v1142_v43 = vsel %vm221_vm3, %v3530_v56, 0.0 }
 0x928   :  { %v1021_v42 = vpop.f32.mrf.mxu1 }
 0x929   :  { %v1028_v44 = vadd.f32 %v1021_v42, %v753_v41 }
 0x92a   :  { %v3271_v48 = vpop.f32.mrf.mxu1 }
 0x92c   :  { %v1024_v45 = vpop.f32.mrf.mxu1 }
 0x92d   :  { %v1029_v50 = vadd.f32 %v1024_v45, %v756_v49  ;;  %v3490_v49 = vld [vmem:[%s4298_s6 + $0x8] sm:$0xff]   ;;  %v3491_v45 = vld [vmem:[%s4298_s6] sm:$0xff]  }
 0x92e   :  { %v3272_v51 = vpop.f32.mrf.mxu1 }
 0x930   :  { %v1124_v52 = vpop.f32.mrf.mxu1 }
 0x931   :  { %v1125_v53 = vadd.f32 %v3748_v36, %v1124_v52 }
 0x932   :  { %v3283_v54 = vpop.f32.mrf.mxu1 }
 0x933   :  { %v1133_v55 = vsel %vm221_vm3, %v1125_v53, -inf }
 0x934   :  { %1134 = vmax.xlane.f32.xlu0 %v1133_v55  ;;  %v1127_v57 = vpop.f32.mrf.mxu1 }
 0x936   :  { %v3284_v24 = vpop.f32.mrf.mxu1 }
 0x938   :  { %1143 = vadd.xlane.f32.xlu0 %v1142_v43  ;;  %v3010_v43 = vld [vmem:[%s4295_s12 + $0x4] ss:$0 sm:$0xff] }
 0x9bd   :  { %v1135_v58 = vpop.xlane.xlu0 %1134 }
 0x9be   :  { %v1137_v59 = vsub.f32 %v1125_v53, %v1135_v58 }
 0x9c0   :  { %v1140_v60 = vmul.f32 1.442695, %v1137_v59 }
 0x9c1   :  { %v1144_v27 = vpop.xlane.xlu0 %1143 }
 0x9c2   :  { %3531 = vpow2.f32 %v1140_v60 }
 0x9c3   :  { %3533 = vrcp.f32 %v1144_v27  ;;  %v3011_v27 = vld [vmem:[%s4295_s12 + $0x5] ss:$0 sm:$0xff] }
 0x9cf   :  { %v3532_v46 = vpop.eup %3531 }
 0x9d0   :  { %v3534_v61 = vpop.eup %3533  ;;  %v1145_v36 = vsel %vm221_vm3, %v3532_v46, 0.0 }
 0x9d1   :  { %1146 = vadd.xlane.f32.xlu0 %v1145_v36  ;;  %v1150_v12 = vmul.f32 %v3534_v61, %v3530_v56 }
 0x9d3   :  { %v1152_v22 = vpack.c.bf16 %v1150_v12, %v1150_v12 }
 0x9d5   :  { %3288 = vmatmul.mubr.msk.bf16.vlgmr.msra.gmra.mxu0 %vm221_vm3, %v1152_v22  ;;  %v3493_v22 = vld [vmem:[%s4299_s7 + $0x10] sm:$0xff]  }
 0x9d6   :  { %3299 = vmatprep.mubr.msk.bf16.mxu0 %vm3586_vm0, %v3585_v0  ;;  %3298 = vmatpush3.bf16.msra.mxu0 %v1256_v62  ;;  %v3495_v62 = vld [vmem:[%s4299_s7] sm:$0xff]  }
 0x9d7   :  { %3311 = vmatprep.subr.bf16.mxu0 %v3585_v0 }
 0x9e7   :  { %1202 = vrot.lane.b32.xlu0 %v3756_v47, %s3594_s0 }
 0xa5a   :  { %v1147_v63 = vpop.xlane.xlu0 %1146 }
 0xa5b   :  { %3535 = vrcp.f32 %v1147_v63  ;;  %v3012_v63 = vld [vmem:[%s4300_s13] ss:$0 sm:$0xff] }
 0xa5e   :  { %v1203_v1 = vpop.permute.xlu0 %1202 }
 0xa5f   :  { %v1208_v2 = vsel %vm344_vm4, %v1203_v1, 0 }
 0xa60   :  { %3292 = vmatpush3.bf16.msra.mxu1 %v1208_v2 }
 0xa61   :  { %3303 = vmatprep.subr.bf16.mxu1 %v3585_v0 }
 0xa68   :  { %v3536_v3 = vpop.eup %3535 }
 0xa69   :  { %v1151_v4 = vmul.f32 %v3536_v3, %v3532_v46 }
 0xa6b   :  { %v1153_v47 = vpack.c.bf16 %v1151_v4, %v1151_v4 }
 0xa6d   :  { %3294 = vmatmul.mubr.msk.bf16.vlgmr.msra.gmra.mxu1 %vm221_vm3, %v1153_v47 }
 0xa6e   :  { %3307 = vmatprep.mubr.msk.bf16.mxu1 %vm3586_vm0, %v3585_v0  ;;  %3304 = vmatpush3.bf16.msra.mxu1 %v3490_v49 }
 0xa6f   :  { %3305 = vmatprep.subr.bf16.mxu1 %v3585_v0 }
 0xa72   :  { %3306 = vmatpush3.bf16.msra.mxu1 %v3491_v45 }
 0xa73   :  { %3323 = vmatprep.subr.bf16.mxu1 %v3585_v0 }
 0xa95   :  { %v1196_v6 = vpop.f32.mrf.mxu0 }
 0xa97   :  { %v3289_v28 = vpop.f32.mrf.mxu0 }
 0xa99   :  { %v1199_v7 = vpop.f32.mrf.mxu0 }
 0xa9b   :  { %v3290_v8 = vpop.f32.mrf.mxu0 }
 0xb2d   :  { %v1244_v9 = vpop.f32.mrf.mxu1 }
 0xb2e   :  { %v1250_v10 = vpack.c.bf16 %v1244_v9, %v1196_v6 }
 0xb2f   :  { %v3295_v11 = vpop.f32.mrf.mxu1 }
 0xb30   :  { %3300 = vmatmul.mubr.msk.bf16.vlgmr.msra.gmra.mxu0 %vm221_vm3, %v1250_v10  ;;  %v3021_v10 = vld [vmem:[%s4295_s12 + $0x6] ss:$0 sm:$0xff] }
 0xb31   :  { %v1247_v13 = vpop.f32.mrf.mxu1  ;;  %3319 = vmatprep.mubr.msk.bf16.mxu0 %vm3586_vm0, %v3585_v0 }
 0xb33   :  { %v3296_v14 = vpop.f32.mrf.mxu1 }
 0xbf0   :  { %v1292_v15 = vpop.f32.mrf.mxu0 }
 0xbf1   :  { %v1299_v17 = vadd.f32 %v1292_v15, %v1028_v44 }
 0xbf2   :  { %v3301_v19 = vpop.f32.mrf.mxu0 }
 0xbf3   :  { %v1306_v20 = vadd.f32 %v3009_v16, %v1299_v17 }
 0xbf4   :  { %v1295_v21 = vpop.f32.mrf.mxu0 }
 0xbf5   :  { %v1300_v25 = vadd.f32 %v1295_v21, %v1029_v50  ;;  %v1310_v26 = vadd.f32 %v1308_v18, %v1306_v20  ;;  %v3492_v50 = vld [vmem:[%s4299_s7 + $0x18] sm:$0xff]   ;;  %s3598_s7 = smov 40  }
 0xbf6   :  { %v3302_v31 = vpop.f32.mrf.mxu0  ;;  %3312 = vmatpush3.bf16.msra.mxu0 %v3492_v50  ;;  %v3022_v50 = vld [vmem:[%s4295_s12 + $0x7] ss:$0 sm:$0xff] }
 0xbf7   :  { %v1307_v32 = vadd.f32 %v3009_v16, %v1300_v25  ;;  %v1312_v33 = vsel %vm80_vm2, %v1310_v26, 0.0  ;;  %3313 = vmatprep.subr.bf16.mxu0 %v3585_v0 }
 0xbf8   :  { %1313 = vadd.xlane.f32.xlu1 %v1312_v33 }
 0xbf9   :  { %v1311_v29 = vadd.f32 %v1309_v30, %v1307_v32 }
 0xbfa   :  { %3314 = vmatpush3.bf16.msra.mxu0 %v3493_v22  ;;  %v3027_v22 = vld [vmem:[%s4295_s12 + $0x9] ss:$0 sm:$0xff] }
 0xbfb   :  { %v1315_v34 = vsel %vm80_vm2, %v1311_v29, 0.0  ;;  %3315 = vmatprep.subr.bf16.mxu0 %v3585_v0 }
 0xbfc   :  { %1316 = vadd.xlane.f32.xlu0 %v1315_v34 }
 0xbfe   :  { %3316 = vmatpush3.bf16.msra.mxu0 %v3494_v23 }
 0xbff   :  { %3317 = vmatprep.subr.bf16.mxu0 %v3585_v0 }
 0xc02   :  { %3318 = vmatpush3.bf16.msra.mxu0 %v3495_v62 }
 0xc03   :  { %3337 = vmatprep.subr.bf16.mxu0 %v3585_v0 }
 0xc81   :  { %v1314_v35 = vpop.xlane.xlu1 %1313 }
 0xc82   :  { %v1319_v37 = vmul.f32 0.03125, %v1314_v35 }
 0xc84   :  { %v1321_v38 = vsub.f32 %v1310_v26, %v1319_v37  ;;  %v3496_v37 = vld [vmem:[%s4301_s8 + $0x8] sm:$0xff]  }
 0xc85   :  { %v1317_v39 = vpop.xlane.xlu0 %1316 }
 0xc86   :  { %v1320_v40 = vmul.f32 0.03125, %v1317_v39  ;;  %v1323_v41 = vmul.f32 %v1321_v38, %v1321_v38  ;;  %v3028_v39 = vld [vmem:[%s4295_s12 + $0xa] ss:$0 sm:$0xff] }
 0xc88   :  { %v1322_v42 = vsub.f32 %v1311_v29, %v1320_v40  ;;  %v1325_v44 = vsel %vm80_vm2, %v1323_v41, 0.0 }
 0xc89   :  { %1326 = vadd.xlane.f32.xlu1 %v1325_v44 }
 0xc8a   :  { %v1324_v5 = vmul.f32 %v1322_v42, %v1322_v42 }
 0xc8c   :  { %v1328_v48 = vsel %vm80_vm2, %v1324_v5, 0.0 }
 0xc8d   :  { %1329 = vadd.xlane.f32.xlu0 %v1328_v48 }
 0xd12   :  { %v1327_v51 = vpop.xlane.xlu1 %1326 }
 0xd13   :  { %v1331_v52 = vmul.f32 0.03125, %v1327_v51 }
 0xd15   :  { %v1333_v53 = vadd.f32 1e-05, %v1331_v52 }
 0xd16   :  { %v1330_v54 = vpop.xlane.xlu0 %1329 }
 0xd17   :  { %3537 = vrsqrt.f32 %v1333_v53  ;;  %v1332_v55 = vmul.f32 0.03125, %v1330_v54  ;;  %v3023_v54 = vld [vmem:[%s4295_s12 + $0x8] ss:$0 sm:$0xff] }
 0xd19   :  { %v1334_v56 = vadd.f32 1e-05, %v1332_v55 }
 0xd1b   :  { %3539 = vrsqrt.f32 %v1334_v56 }
 0xd24   :  { %v3538_v57 = vpop.eup %3537 }
 0xd25   :  { %v1337_v24 = vmul.f32 %v3538_v57, %v1321_v38  ;;  %v3497_v38 = vld [vmem:[%s4301_s8] sm:$0xff]  }
 0xd27   :  { %v1344_v60 = vmul.f32 %v3010_v43, %v1337_v24 }
 0xd28   :  { %v3540_v58 = vpop.eup %3539 }
 0xd29   :  { %v1338_v59 = vmul.f32 %v3540_v58, %v1322_v42  ;;  %v1351_v61 = vadd.f32 %v3011_v27, %v1344_v60 }
 0xd2b   :  { %v1345_v46 = vmul.f32 %v3010_v43, %v1338_v59 }
 0xd2d   :  { %v1352_v36 = vadd.f32 %v3011_v27, %v1345_v46 }
 0xd2f   :  { %v1353_v12 = vpack.c.bf16 %v1352_v36, %v1351_v61 }
 0xd31   :  { %3308 = vmatmul.mubr.msk.bf16.vlgmr.msra.gmra.mxu1 %vm80_vm2, %v1353_v12 }
 0xd32   :  { %3327 = vmatprep.mubr.msk.bf16.mxu1 %vm3586_vm0, %v3585_v0  ;;  %3324 = vmatpush3.bf16.msra.mxu1 %v3496_v37 }
 0xd33   :  { %3325 = vmatprep.subr.bf16.mxu1 %v3585_v0 }
 0xd36   :  { %3326 = vmatpush3.bf16.msra.mxu1 %v3497_v38 }
 0xd37   :  { %3331 = vmatprep.subr.bf16.mxu1 %v3585_v0 }
 0xdf1   :  { %v1412_v1 = vpop.f32.mrf.mxu1 }
 0xdf2   :  { %v1413_v3 = vadd.f32 %v3012_v63, %v1412_v1 }
 0xdf3   :  { %v3309_v2 = vpop.f32.mrf.mxu1 }
 0xdf4   :  { %v1419_v28 = vmax.f32 %v1413_v3, 0.0 }
 0xdf5   :  { %v1415_v4 = vpop.f32.mrf.mxu1 }
 0xdf6   :  { %v1416_v47 = vadd.f32 %v3012_v63, %v1415_v4 }
 0xdf7   :  { %v3310_v6 = vpop.f32.mrf.mxu1 }
 0xdf8   :  { %v1420_v7 = vmax.f32 %v1416_v47, 0.0 }
 0xdfa   :  { %v1421_v8 = vpack.c.bf16 %v1420_v7, %v1419_v28 }
 0xdfc   :  { %3320 = vmatmul.mubr.msk.bf16.vlgmr.msra.gmra.mxu0 %vm1454_vm5, %v1421_v8 }
 0xdfd   :  { %3339 = vmatprep.mubr.msk.bf16.mxu0 %vm3586_vm0, %v3585_v0 }
 0xebc   :  { %v1492_v9 = vpop.f32.mrf.mxu0 }
 0xebd   :  { %v1499_v11 = vadd.f32 %v1492_v9, %v1351_v61 }
 0xebe   :  { %v3321_v13 = vpop.f32.mrf.mxu0 }
 0xebf   :  { %v1506_v14 = vadd.f32 %v3021_v10, %v1499_v11 }
 0xec0   :  { %v1495_v15 = vpop.f32.mrf.mxu0 }
 0xec1   :  { %v1500_v16 = vadd.f32 %v1495_v15, %v1352_v36  ;;  %v1508_v17 = vsel %vm80_vm2, %v1506_v14, 0.0 }
 0xec2   :  { %1509 = vadd.xlane.f32.xlu1 %v1508_v17  ;;  %v3322_v18 = vpop.f32.mrf.mxu0 }
 0xec3   :  { %v1507_v19 = vadd.f32 %v3021_v10, %v1500_v16  ;;  %v3029_v18 = vld [vmem:[%s4295_s12 + $0xb] ss:$0 sm:$0xff] }
 0xec5   :  { %v1511_v20 = vsel %vm80_vm2, %v1507_v19, 0.0 }
 0xec6   :  { %1512 = vadd.xlane.f32.xlu0 %v1511_v20 }
 0xf4b   :  { %v1510_v21 = vpop.xlane.xlu1 %1509 }
 0xf4c   :  { %v1514_v25 = vmul.f32 0.03125, %v1510_v21 }
 0xf4e   :  { %v1516_v26 = vsub.f32 %v1506_v14, %v1514_v25 }
 0xf4f   :  { %v1513_v30 = vpop.xlane.xlu0 %1512 }
 0xf50   :  { %v1515_v31 = vmul.f32 0.03125, %v1513_v30  ;;  %v1518_v32 = vmul.f32 %v1516_v26, %v1516_v26 }
 0xf52   :  { %v1517_v33 = vsub.f32 %v1507_v19, %v1515_v31  ;;  %v1520_v29 = vsel %vm80_vm2, %v1518_v32, 0.0 }
 0xf53   :  { %1521 = vadd.xlane.f32.xlu1 %v1520_v29 }
 0xf54   :  { %v1519_v34 = vmul.f32 %v1517_v33, %v1517_v33 }
 0xf56   :  { %v1523_v35 = vsel %vm80_vm2, %v1519_v34, 0.0 }
 0xf57   :  { %1524 = vadd.xlane.f32.xlu0 %v1523_v35 }
 0xf64   :  { %1622 = vrot.lane.b32.xlu1 %v3028_v39, %s3587_s1 }
 0xfdc   :  { %v1522_v40 = vpop.xlane.xlu1 %1521 }
 0xfdd   :  { %v1526_v41 = vmul.f32 0.03125, %v1522_v40 }
 0xfdf   :  { %v1528_v42 = vadd.f32 1e-05, %v1526_v41 }
 0xfe0   :  { %v1525_v44 = vpop.xlane.xlu0 %1524  ;;  %v1623_v43 = vpop.permute.xlu1 %1622 }
 0xfe1   :  { %3541 = vrsqrt.f32 %v1528_v42  ;;  %v1527_v5 = vmul.f32 0.03125, %v1525_v44 }
 0xfe3   :  { %v1529_v48 = vadd.f32 1e-05, %v1527_v5 }
 0xfe5   :  { %3543 = vrsqrt.f32 %v1529_v48 }
 0xfee   :  { %v3542_v49 = vpop.eup %3541 }
 0xfef   :  { %v1532_v45 = vmul.f32 %v3542_v49, %v1516_v26 }
 0xff1   :  { %v1539_v53 = vmul.f32 %v3022_v50, %v1532_v45 }
 0xff2   :  { %v3544_v51 = vpop.eup %3543 }
 0xff3   :  { %v1533_v52 = vmul.f32 %v3544_v51, %v1517_v33  ;;  %v4012_v56 = vadd.f32 %v3023_v54, %v1539_v53 }
 0xff5   :  { %v1540_v55 = vmul.f32 %v3022_v50, %v1533_v52 }
 0xff7   :  { %v4014_v57 = vadd.f32 %v3023_v54, %v1540_v55 }
 0xff9   :  { %v1548_v24 = vpack.c.bf16 %v4014_v57, %v4012_v56 }
 0xffb   :  { %3328 = vmatmul.mubr.msk.bf16.vlgmr.msra.gmra.mxu1 %vm80_vm2, %v1548_v24 }
 0xffc   :  { %3333 = vmatprep.mubr.msk.bf16.mxu1 %vm3586_vm0, %v3585_v0 }
0x10bb   :  { %v1602_v58 = vpop.f32.mrf.mxu1 }
0x10bc   :  { %v1625_v59 = vadd.f32 %v1623_v43, %v1602_v58  ;;  %v1614_v23 = vadd.f32 %v3027_v22, %v1602_v58 }
0x10bd   :  { %v3329_v60 = vpop.f32.mrf.mxu1 }
0x10be   :  { %v4021_v27 = vpack.c.bf16 %v1625_v59, %v1625_v59  ;;  %v1638_v1 = vmul.f32 0.35355338, %v1614_v23 }
0x10bf   :  { %v1605_v46 = vpop.f32.mrf.mxu1 }
0x10c0   :  { %v1626_v61 = vadd.f32 %v1623_v43, %v1605_v46  ;;  %1647 = vrot.lane.b32.xlu0 %v4021_v27, %s3588_s30  ;;  %v1615_v2 = vadd.f32 %v3027_v22, %v1605_v46  ;;  %v4035_v47 = vpack.c.bf16 %v1638_v1, %v1638_v1 }
0x10c1   :  { %v3330_v36 = vpop.f32.mrf.mxu1 }
0x10c2   :  { %v4025_v12 = vpack.c.bf16 %v1626_v61, %v1626_v61  ;;  %v1639_v6 = vmul.f32 0.35355338, %v1615_v2 }
0x10c4   :  { %1696 = vrot.lane.b32.xlu1 %v4025_v12, %s3588_s30  ;;  %v4042_v28 = vpack.c.bf16 %v1639_v6, %v1639_v6 }
0x1132   :  { %v1648_v62 = vpop.permute.xlu0 %1647 }
0x1133   :  { %v1653_v63 = vsel %vm221_vm3, %v1648_v62, 0 }
0x1134   :  { %3332 = vmatpush3.bf16.xpose.msra.mxu1 %v1653_v63 }
0x1135   :  { %3343 = vmatprep.subr.bf16.mxu1 %v3585_v0 }
0x1136   :  { %v1697_v3 = vpop.permute.xlu1 %1696 }
0x1137   :  { %v1702_v4 = vsel %vm221_vm3, %v1697_v3, 0 }
0x1138   :  { %3338 = vmatpush3.bf16.xpose.msra.mxu0 %v1702_v4 }
0x1139   :  { %3349 = vmatprep.subr.bf16.mxu0 %v3585_v0 }
0x113b   :  { %3334 = vmatmul.mubr.msk.bf16.vlgmr.msra.gmra.mxu1 %vm221_vm3, %v4035_v47 }
0x113c   :  { %3345 = vmatprep.mubr.msk.bf16.mxu1 %vm3586_vm0, %v3585_v0 }
0x113f   :  { %3340 = vmatmul.mubr.msk.bf16.vlgmr.msra.gmra.mxu0 %vm221_vm3, %v4042_v28 }
0x1140   :  { %3351 = vmatprep.mubr.msk.bf16.mxu0 %vm3586_vm0, %v3585_v0 }
0x11fb   :  { %v1689_v7 = vpop.f32.mrf.mxu1 }
0x11fc   :  { %v1744_v8 = vsel %vm221_vm3, %v1689_v7, -inf }
0x11fd   :  { %1745 = vmax.xlane.f32.xlu1 %v1744_v8  ;;  %v3335_v9 = vpop.f32.mrf.mxu1 }
0x11ff   :  { %v1692_v10 = vpop.f32.mrf.mxu1  ;;  %v1738_v11 = vpop.f32.mrf.mxu0 }
0x1200   :  { %v1747_v13 = vsel %vm221_vm3, %v1738_v11, -inf }
0x1201   :  { %v3336_v14 = vpop.f32.mrf.mxu1  ;;  %1748 = vmax.xlane.f32.xlu0 %v1747_v13  ;;  %v3341_v15 = vpop.f32.mrf.mxu0 }
0x1203   :  { %v1741_v16 = vpop.f32.mrf.mxu0 }
0x1205   :  { %v3342_v17 = vpop.f32.mrf.mxu0 }
0x1217   :  { %1633 = vrot.lane.b32.xlu0 %v3029_v18, %s3595_s26 }
0x1286   :  { %v1746_v31 = vpop.xlane.xlu1 %1745 }
0x1287   :  { %v1750_v32 = vsub.f32 %v1689_v7, %v1746_v31 }
0x1289   :  { %v1752_v33 = vmul.f32 1.442695, %v1750_v32 }
0x128a   :  { %v1749_v19 = vpop.xlane.xlu0 %1748 }
0x128b   :  { %v1751_v29 = vsub.f32 %v1738_v11, %v1749_v19  ;;  %3545 = vpow2.f32 %v1752_v33 }
0x128d   :  { %v1754_v34 = vmul.f32 1.442695, %v1751_v29 }
0x128e   :  { %v1634_v20 = vpop.permute.xlu0 %1633 }
0x128f   :  { %v1636_v21 = vadd.f32 %v1634_v20, %v1602_v58  ;;  %v1637_v25 = vadd.f32 %v1634_v20, %v1605_v46  ;;  %3547 = vpow2.f32 %v1754_v34 }
0x1291   :  { %v4053_v26 = vpack.c.bf16 %v1636_v21, %v1636_v21  ;;  %v4055_v30 = vpack.c.bf16 %v1637_v25, %v1637_v25 }
0x1293   :  { %1818 = vrot.lane.b32.xlu0 %v4055_v30, %s3595_s26  ;;  %1769 = vrot.lane.b32.xlu1 %v4053_v26, %s3595_s26 }
0x1297   :  { %1922 = vrot.lane.b32.xlu0 %v4025_v12, %s3590_s15 }
0x1298   :  { %v3546_v35 = vpop.eup %3545 }
0x1299   :  { %v1756_v37 = vsel %vm221_vm3, %v3546_v35, 0.0 }
0x129b   :  { %1920 = vrot.lane.b32.xlu0 %v4042_v28, %s3589_s2 }
0x129c   :  { %v3548_v38 = vpop.eup %3547 }
0x129d   :  { %v1759_v39 = vsel %vm221_vm3, %v3548_v38, 0.0 }
0x12b7   :  { %1757 = vadd.xlane.f32.xlu1 %v1756_v37 }
0x12bb   :  { %1760 = vadd.xlane.f32.xlu1 %v1759_v39 }
0x12cc   :  { %1871 = vrot.lane.b32.xlu1 %v4021_v27, %s3590_s15 }
0x12d0   :  { %1869 = vrot.lane.b32.xlu1 %v4035_v47, %s3589_s2  ;;  %s3596_s2 = smov 56  }
0x1305   :  { %v1819_v40 = vpop.permute.xlu0 %1818  ;;  %v1770_v41 = vpop.permute.xlu1 %1769 }
0x1306   :  { %v1824_v42 = vsel %vm344_vm4, %v1819_v40, 0  ;;  %v1775_v44 = vsel %vm344_vm4, %v1770_v41, 0 }
0x1307   :  { %3344 = vmatpush3.bf16.msra.mxu1 %v1775_v44  ;;  %3350 = vmatpush3.bf16.msra.mxu0 %v1824_v42  ;;  %v1867_v42 = vld [vmem:[%s4302_s9] sm:$0xf] }
0x1308   :  { %3355 = vmatprep.subr.bf16.mxu1 %v3585_v0  ;;  %3361 = vmatprep.subr.bf16.mxu0 %v3585_v0 }
0x1309   :  { %v1923_v55 = vpop.permute.xlu0 %1922 }
0x130a   :  { %v1928_v43 = vsel %vm221_vm3, %v1923_v55, 0 }
0x130d   :  { %v1921_v59 = vpop.permute.xlu0 %1920 }
0x1340   :  { %v1758_v5 = vpop.xlane.xlu1 %1757 }
0x1341   :  { %3549 = vrcp.f32 %v1758_v5 }
0x1344   :  { %v1761_v48 = vpop.xlane.xlu1 %1760 }
0x1345   :  { %3551 = vrcp.f32 %v1761_v48  ;;  %v2143_v48 = vsel %vm344_vm4, %v1867_v42, 0 }
0x1348   :  { %v1872_v50 = vpop.permute.xlu1 %1871 }
0x1349   :  { %v1877_v53 = vsel %vm221_vm3, %v1872_v50, 0 }
0x134c   :  { %v1870_v58 = vpop.permute.xlu1 %1869 }
0x134e   :  { %v3550_v49 = vpop.eup %3549 }
0x134f   :  { %v1764_v45 = vmul.f32 %v3550_v49, %v3546_v35 }
0x1351   :  { %v1766_v51 = vpack.c.bf16 %v1764_v45, %v1764_v45 }
0x1352   :  { %v3552_v52 = vpop.eup %3551 }
0x1353   :  { %3346 = vmatmul.mubr.msk.bf16.vlgmr.msra.gmra.mxu1 %vm221_vm3, %v1766_v51  ;;  %v1765_v54 = vmul.f32 %v3552_v52, %v3548_v38  ;;  %v2091_v52 = vld [vmem:[%s4302_s9 + $0x4] sm:$0xf] }
0x1354   :  { %3356 = vmatpush3.bf16.xpose.msra.mxu1 %v1877_v53  ;;  %3357 = vmatprep.mubr.msk.bf16.mxu1 %vm3586_vm0, %v3585_v0  ;;  %v2096_v53 = vsel %vm344_vm4, %v2091_v52, 0 }
0x1355   :  { %v1767_v24 = vpack.c.bf16 %v1765_v54, %v1765_v54  ;;  %3367 = vmatprep.subr.bf16.mxu1 %v3585_v0 }
0x1357   :  { %3352 = vmatmul.mubr.msk.bf16.vlgmr.msra.gmra.mxu0 %vm221_vm3, %v1767_v24 }
0x1358   :  { %3362 = vmatpush3.bf16.xpose.msra.mxu0 %v1928_v43  ;;  %3363 = vmatprep.mubr.msk.bf16.mxu0 %vm3586_vm0, %v3585_v0 }
0x1359   :  { %3373 = vmatprep.subr.bf16.mxu0 %v3585_v0 }
0x135b   :  { %3358 = vmatmul.mubr.msk.bf16.vlgmr.msra.gmra.mxu1 %vm221_vm3, %v1870_v58 }
0x135c   :  { %3369 = vmatprep.mubr.msk.bf16.mxu1 %vm3586_vm0, %v3585_v0 }
0x135f   :  { %3364 = vmatmul.mubr.msk.bf16.vlgmr.msra.gmra.mxu0 %vm221_vm3, %v1921_v59 }
0x1360   :  { %3375 = vmatprep.mubr.msk.bf16.mxu0 %vm3586_vm0, %v3585_v0 }
0x1413   :  { %v4089_v60 = vpop.f32.mrf.mxu1 }
0x1415   :  { %v3347_v46 = vpop.f32.mrf.mxu1 }
0x1417   :  { %v1814_v61 = vpop.f32.mrf.mxu1  ;;  %v4091_v36 = vpop.f32.mrf.mxu0 }
0x1418   :  { %v1866_v22 = vpack.c.bf16 %v4091_v36, %v4089_v60 }
0x1419   :  { %v3348_v23 = vpop.f32.mrf.mxu1  ;;  %v3353_v62 = vpop.f32.mrf.mxu0 }
0x141b   :  { %v1863_v63 = vpop.f32.mrf.mxu0  ;;  %v1913_v1 = vpop.f32.mrf.mxu1 }
0x141c   :  { %v1970_v2 = vsel %vm221_vm3, %v1913_v1, -inf }
0x141d   :  { %1971 = vmax.xlane.f32.xlu1 %v1970_v2  ;;  %v3354_v3 = vpop.f32.mrf.mxu0  ;;  %v3359_v4 = vpop.f32.mrf.mxu1 }
0x141f   :  { %v1916_v6 = vpop.f32.mrf.mxu1  ;;  %v1964_v7 = vpop.f32.mrf.mxu0 }
0x1420   :  { %v1973_v8 = vsel %vm221_vm3, %v1964_v7, -inf }
0x1421   :  { %v3360_v9 = vpop.f32.mrf.mxu1  ;;  %1974 = vmax.xlane.f32.xlu0 %v1973_v8  ;;  %v3365_v10 = vpop.f32.mrf.mxu0 }
0x1423   :  { %v1967_v11 = vpop.f32.mrf.mxu0 }
0x1425   :  { %v3366_v13 = vpop.f32.mrf.mxu0 }
0x142e   :  { %1994 = vrot.lane.b32.xlu1 %v4053_v26, %s3596_s2 }
0x1432   :  { %2188 = vrot.lane.b32.xlu1 %v4021_v27, %s3592_s4 }
0x1436   :  { %2238 = vrot.lane.b32.xlu1 %v4025_v12, %s3592_s4 }
0x143a   :  { %2186 = vrot.lane.b32.xlu1 %v4035_v47, %s3591_s16 }
0x14a6   :  { %v1972_v14 = vpop.xlane.xlu1 %1971 }
0x14a7   :  { %v1976_v15 = vsub.f32 %v1913_v1, %v1972_v14 }
0x14a9   :  { %v1978_v16 = vmul.f32 1.442695, %v1976_v15 }
0x14aa   :  { %v1995_v17 = vpop.permute.xlu1 %1994  ;;  %v1975_v18 = vpop.xlane.xlu0 %1974 }
0x14ab   :  { %3553 = vpow2.f32 %v1978_v16  ;;  %v2000_v19 = vsel %vm344_vm4, %v1995_v17, 0  ;;  %v1977_v20 = vsub.f32 %v1964_v7, %v1975_v18 }
0x14ac   :  { %3368 = vmatpush3.bf16.msra.mxu1 %v2000_v19 }
0x14ad   :  { %v1980_v21 = vmul.f32 1.442695, %v1977_v20  ;;  %3379 = vmatprep.subr.bf16.mxu1 %v3585_v0 }
0x14ae   :  { %v2189_v49 = vpop.permute.xlu1 %2188 }
0x14af   :  { %3555 = vpow2.f32 %v1980_v21  ;;  %v2194_v46 = vsel %vm221_vm3, %v2189_v49, 0 }
0x14b2   :  { %v2239_v45 = vpop.permute.xlu1 %2238 }
0x14b3   :  { %v2244_v50 = vsel %vm221_vm3, %v2239_v45, 0 }
0x14b6   :  { %v2187_v23 = vpop.permute.xlu1 %2186 }
0x14b8   :  { %v3554_v25 = vpop.eup %3553 }
0x14b9   :  { %v1982_v31 = vsel %vm221_vm3, %v3554_v25, 0.0 }
0x14ba   :  { %1983 = vadd.xlane.f32.xlu0 %v1982_v31 }
0x14bc   :  { %v3556_v32 = vpop.eup %3555 }
0x14bd   :  { %v1985_v33 = vsel %vm221_vm3, %v3556_v32, 0.0 }
0x14be   :  { %1986 = vadd.xlane.f32.xlu0 %v1985_v33 }
0x14d4   :  { %2042 = vrot.lane.b32.xlu0 %v4055_v30, %s3596_s2 }
0x14d8   :  { %2236 = vrot.lane.b32.xlu0 %v4042_v28, %s3591_s16 }
0x1543   :  { %v1984_v29 = vpop.xlane.xlu0 %1983 }
0x1544   :  { %3557 = vrcp.f32 %v1984_v29 }
0x1547   :  { %v1987_v34 = vpop.xlane.xlu0 %1986 }
0x1548   :  { %3559 = vrcp.f32 %v1987_v34 }
0x154b   :  { %v2043_v35 = vpop.permute.xlu0 %2042 }
0x154c   :  { %v2048_v37 = vsel %vm344_vm4, %v2043_v35, 0 }
0x154d   :  { %3374 = vmatpush3.bf16.msra.mxu0 %v2048_v37 }
0x154e   :  { %3385 = vmatprep.subr.bf16.mxu0 %v3585_v0 }
0x154f   :  { %v2237_v51 = vpop.permute.xlu0 %2236 }
0x1551   :  { %v3558_v38 = vpop.eup %3557 }
0x1552   :  { %v1990_v39 = vmul.f32 %v3558_v38, %v3554_v25 }
0x1554   :  { %v1992_v40 = vpack.c.bf16 %v1990_v39, %v1990_v39 }
0x1555   :  { %v3560_v41 = vpop.eup %3559 }
0x1556   :  { %3370 = vmatmul.mubr.msk.bf16.vlgmr.msra.gmra.mxu1 %vm221_vm3, %v1992_v40  ;;  %v1991_v44 = vmul.f32 %v3560_v41, %v3556_v32 }
0x1557   :  { %3381 = vmatprep.mubr.msk.bf16.mxu1 %vm3586_vm0, %v3585_v0  ;;  %3380 = vmatpush3.bf16.msra.mxu1 %v2096_v53 }
0x1558   :  { %v1993_v5 = vpack.c.bf16 %v1991_v44, %v1991_v44  ;;  %3391 = vmatprep.subr.bf16.mxu1 %v3585_v0 }
0x155a   :  { %3376 = vmatmul.mubr.msk.bf16.vlgmr.msra.gmra.mxu0 %vm221_vm3, %v1993_v5 }
0x155b   :  { %3386 = vmatpush3.bf16.msra.mxu0 %v2143_v48  ;;  %3387 = vmatprep.mubr.msk.bf16.mxu0 %vm3586_vm0, %v3585_v0 }
0x155c   :  { %3397 = vmatprep.subr.bf16.mxu0 %v3585_v0 }
0x1562   :  { %3388 = vmatmul.mubr.msk.bf16.vlgmr.msra.gmra.mxu0 %vm221_vm3, %v1866_v22 }
0x1563   :  { %3398 = vmatpush3.bf16.xpose.msra.mxu0 %v2244_v50  ;;  %3399 = vmatprep.mubr.msk.bf16.mxu0 %vm3586_vm0, %v3585_v0  ;;  %v2407_v50 = vld [vmem:[%s4302_s9 + $0x8] sm:$0xf] }
0x1564   :  { %3409 = vmatprep.subr.bf16.mxu0 %v3585_v0 }
0x156a   :  { %3400 = vmatmul.mubr.msk.bf16.vlgmr.msra.gmra.mxu0 %vm221_vm3, %v2237_v51  ;;  %v2412_v51 = vsel %vm344_vm4, %v2407_v50, 0 }
0x156b   :  { %3411 = vmatprep.mubr.msk.bf16.mxu0 %vm3586_vm0, %v3585_v0 }
0x1616   :  { %v2036_v54 = vpop.f32.mrf.mxu1 }
0x1618   :  { %v3371_v55 = vpop.f32.mrf.mxu1 }
0x161a   :  { %v2039_v24 = vpop.f32.mrf.mxu1  ;;  %v2084_v43 = vpop.f32.mrf.mxu0 }
0x161b   :  { %v2090_v58 = vpack.c.bf16 %v2084_v43, %v2036_v54 }
0x161c   :  { %v3372_v59 = vpop.f32.mrf.mxu1  ;;  %v3377_v60 = vpop.f32.mrf.mxu0 }
0x161d   :  { %3382 = vmatmul.mubr.msk.bf16.vlgmr.msra.gmra.mxu1 %vm221_vm3, %v2090_v58 }
0x161e   :  { %3392 = vmatpush3.bf16.xpose.msra.mxu1 %v2194_v46  ;;  %v2087_v61 = vpop.f32.mrf.mxu0  ;;  %3393 = vmatprep.mubr.msk.bf16.mxu1 %vm3586_vm0, %v3585_v0 }
0x161f   :  { %3403 = vmatprep.subr.bf16.mxu1 %v3585_v0 }
0x1620   :  { %v3378_v36 = vpop.f32.mrf.mxu0 }
0x1622   :  { %v4145_v22 = vpop.f32.mrf.mxu0 }
0x1624   :  { %v3389_v62 = vpop.f32.mrf.mxu0 }
0x1625   :  { %3394 = vmatmul.mubr.msk.bf16.vlgmr.msra.gmra.mxu1 %vm221_vm3, %v2187_v23 }
0x1626   :  { %v4148_v63 = vpop.f32.mrf.mxu0  ;;  %3405 = vmatprep.mubr.msk.bf16.mxu1 %vm3586_vm0, %v3585_v0 }
0x1628   :  { %v3390_v1 = vpop.f32.mrf.mxu0 }
0x162a   :  { %v2280_v2 = vpop.f32.mrf.mxu0 }
0x162b   :  { %v2289_v3 = vsel %vm221_vm3, %v2280_v2, -inf }
0x162c   :  { %2290 = vmax.xlane.f32.xlu0 %v2289_v3  ;;  %v3401_v4 = vpop.f32.mrf.mxu0 }
0x162e   :  { %v2283_v6 = vpop.f32.mrf.mxu0 }
0x1630   :  { %v3402_v7 = vpop.f32.mrf.mxu0 }
0x16b5   :  { %v2291_v8 = vpop.xlane.xlu0 %2290 }
0x16b6   :  { %v2293_v9 = vsub.f32 %v2280_v2, %v2291_v8 }
0x16b8   :  { %v2296_v10 = vmul.f32 1.442695, %v2293_v9 }
0x16ba   :  { %3561 = vpow2.f32 %v2296_v10 }
0x16c7   :  { %v3562_v11 = vpop.eup %3561 }
0x16c8   :  { %v2301_v13 = vsel %vm221_vm3, %v3562_v11, 0.0 }
0x16c9   :  { %2302 = vadd.xlane.f32.xlu0 %v2301_v13 }
0x16dd   :  { %v4154_v14 = vpop.f32.mrf.mxu1 }
0x16de   :  { %v2180_v9 = vadd.f32 %v4145_v22, %v4154_v14 }
0x16df   :  { %v3383_v15 = vpop.f32.mrf.mxu1 }
0x16e1   :  { %v4156_v16 = vpop.f32.mrf.mxu1 }
0x16e2   :  { %v2183_v15 = vadd.f32 %v4148_v63, %v4156_v16 }
0x16e3   :  { %v3384_v17 = vpop.f32.mrf.mxu1 }
0x16e5   :  { %v2230_v18 = vpop.f32.mrf.mxu1 }
0x16e6   :  { %v2286_v19 = vsel %vm221_vm3, %v2230_v18, -inf }
0x16e7   :  { %2287 = vmax.xlane.f32.xlu1 %v2286_v19  ;;  %v3395_v20 = vpop.f32.mrf.mxu1 }
0x16e9   :  { %v2233_v21 = vpop.f32.mrf.mxu1 }
0x16eb   :  { %v3396_v25 = vpop.f32.mrf.mxu1 }
0x16f8   :  { %2310 = vrot.lane.b32.xlu1 %v4053_v26, %s3597_s28 }
0x16fc   :  { %2459 = vrot.lane.b32.xlu1 %v4021_v27, %s3594_s0 }
0x1700   :  { %2509 = vrot.lane.b32.xlu1 %v4025_v12, %s3594_s0 }
0x1704   :  { %2457 = vrot.lane.b32.xlu1 %v4035_v47, %s3593_s21 }
0x1752   :  { %v2303_v27 = vpop.xlane.xlu0 %2302 }
0x1770   :  { %v2288_v31 = vpop.xlane.xlu1 %2287 }
0x1771   :  { %v2292_v32 = vsub.f32 %v2230_v18, %v2288_v31 }
0x1773   :  { %v2294_v33 = vmul.f32 1.442695, %v2292_v32 }
0x1774   :  { %v2311_v29 = vpop.permute.xlu1 %2310 }
0x1775   :  { %3563 = vpow2.f32 %v2294_v33  ;;  %v2316_v34 = vsel %vm344_vm4, %v2311_v29, 0 }
0x1776   :  { %3404 = vmatpush3.bf16.msra.mxu1 %v2316_v34  ;;  %3565 = vrcp.f32 %v2303_v27 }
0x1777   :  { %3415 = vmatprep.subr.bf16.mxu1 %v3585_v0 }
0x1778   :  { %v2460_v39 = vpop.permute.xlu1 %2459 }
0x1779   :  { %v2465_v44 = vsel %vm221_vm3, %v2460_v39, 0 }
0x177c   :  { %v2510_v5 = vpop.permute.xlu1 %2509 }
0x177d   :  { %v2515_v36 = vsel %vm221_vm3, %v2510_v5, 0 }
0x1780   :  { %v2458_v49 = vpop.permute.xlu1 %2457 }
0x1782   :  { %v3564_v35 = vpop.eup %3563 }
0x1783   :  { %v2298_v37 = vsel %vm221_vm3, %v3564_v35, 0.0  ;;  %v3566_v12 = vpop.eup %3565 }
0x1784   :  { %2299 = vadd.xlane.f32.xlu0 %v2298_v37  ;;  %v2307_v38 = vmul.f32 %v3566_v12, %v3562_v11  ;;  %v2678_v12 = vld [vmem:[%s4302_s9 + $0xc] sm:$0xf] }
0x1786   :  { %v2309_v42 = vpack.c.bf16 %v2307_v38, %v2307_v38 }
0x179a   :  { %2358 = vrot.lane.b32.xlu0 %v4055_v30, %s3597_s28 }
0x179e   :  { %2507 = vrot.lane.b32.xlu0 %v4042_v28, %s3593_s21 }
0x180d   :  { %v2300_v47 = vpop.xlane.xlu0 %2299 }
0x180e   :  { %3567 = vrcp.f32 %v2300_v47  ;;  %v2683_v47 = vsel %vm344_vm4, %v2678_v12, 0  ;;  %v3053_v12 = vld [vmem:[%s4300_s13 + $0x1] ss:$0 sm:$0xff] }
0x1811   :  { %v2359_v40 = vpop.permute.xlu0 %2358 }
0x1812   :  { %v2364_v41 = vsel %vm344_vm4, %v2359_v40, 0 }
0x1813   :  { %3410 = vmatpush3.bf16.msra.mxu0 %v2364_v41 }
0x1814   :  { %3421 = vmatprep.subr.bf16.mxu0 %v3585_v0 }
0x1815   :  { %v2508_v2 = vpop.permute.xlu0 %2507 }
0x1816   :  { %3412 = vmatmul.mubr.msk.bf16.vlgmr.msra.gmra.mxu0 %vm221_vm3, %v2309_v42 }
0x1817   :  { %3422 = vmatpush3.bf16.xpose.msra.mxu0 %v2465_v44  ;;  %3423 = vmatprep.mubr.msk.bf16.mxu0 %vm3586_vm0, %v3585_v0 }
0x1818   :  { %3433 = vmatprep.subr.bf16.mxu0 %v3585_v0 }
0x181b   :  { %v3568_v28 = vpop.eup %3567 }
0x181c   :  { %v2306_v48 = vmul.f32 %v3568_v28, %v3564_v35 }
0x181e   :  { %3424 = vmatmul.mubr.msk.bf16.vlgmr.msra.gmra.mxu0 %vm221_vm3, %v2458_v49  ;;  %v2308_v45 = vpack.c.bf16 %v2306_v48, %v2306_v48 }
0x181f   :  { %3435 = vmatprep.mubr.msk.bf16.mxu0 %vm3586_vm0, %v3585_v0 }
0x1820   :  { %3406 = vmatmul.mubr.msk.bf16.vlgmr.msra.gmra.mxu1 %vm221_vm3, %v2308_v45 }
0x1821   :  { %3417 = vmatprep.mubr.msk.bf16.mxu1 %vm3586_vm0, %v3585_v0  ;;  %3416 = vmatpush3.bf16.msra.mxu1 %v2412_v51 }
0x1822   :  { %3427 = vmatprep.subr.bf16.mxu1 %v3585_v0 }
0x18d6   :  { %v2400_v52 = vpop.f32.mrf.mxu0 }
0x18d8   :  { %v3413_v53 = vpop.f32.mrf.mxu0 }
0x18da   :  { %v2403_v54 = vpop.f32.mrf.mxu0 }
0x18db   :  { %v3050_v54 = vld [vmem:[%s4295_s12 + $0xc] ss:$0 sm:$0xff] }
0x18dc   :  { %v3414_v55 = vpop.f32.mrf.mxu0 }
0x18de   :  { %v2501_v24 = vpop.f32.mrf.mxu0 }
0x18df   :  { %v2557_v43 = vsel %vm221_vm3, %v2501_v24, -inf }
0x18e0   :  { %v2352_v58 = vpop.f32.mrf.mxu1  ;;  %2558 = vmax.xlane.f32.xlu1 %v2557_v43  ;;  %v3425_v59 = vpop.f32.mrf.mxu0 }
0x18e1   :  { %v2406_v60 = vpack.c.bf16 %v2400_v52, %v2352_v58 }
0x18e2   :  { %v3407_v46 = vpop.f32.mrf.mxu1  ;;  %v2504_v61 = vpop.f32.mrf.mxu0 }
0x18e3   :  { %3418 = vmatmul.mubr.msk.bf16.vlgmr.msra.gmra.mxu1 %vm221_vm3, %v2406_v60 }
0x18e4   :  { %3428 = vmatpush3.bf16.xpose.msra.mxu1 %v2515_v36  ;;  %v2355_v23 = vpop.f32.mrf.mxu1  ;;  %v3426_v62 = vpop.f32.mrf.mxu0  ;;  %3429 = vmatprep.mubr.msk.bf16.mxu1 %vm3586_vm0, %v3585_v0 }
0x18e5   :  { %3439 = vmatprep.subr.bf16.mxu1 %v3585_v0 }
0x18e6   :  { %v3408_v1 = vpop.f32.mrf.mxu1 }
0x18eb   :  { %3430 = vmatmul.mubr.msk.bf16.vlgmr.msra.gmra.mxu1 %vm221_vm3, %v2508_v2 }
0x18ec   :  { %3441 = vmatprep.mubr.msk.bf16.mxu1 %vm3586_vm0, %v3585_v0 }
0x18f1   :  { %2581 = vrot.lane.b32.xlu1 %v4053_v26, %s3598_s7 }
0x1969   :  { %v2559_v3 = vpop.xlane.xlu1 %2558 }
0x196a   :  { %v2563_v7 = vsub.f32 %v2501_v24, %v2559_v3 }
0x196c   :  { %v2565_v8 = vmul.f32 1.442695, %v2563_v7 }
0x196d   :  { %v2582_v4 = vpop.permute.xlu1 %2581 }
0x196e   :  { %v2587_v6 = vsel %vm344_vm4, %v2582_v4, 0  ;;  %3569 = vpow2.f32 %v2565_v8 }
0x196f   :  { %3434 = vmatpush3.bf16.msra.mxu0 %v2587_v6 }
0x1970   :  { %3445 = vmatprep.subr.bf16.mxu0 %v3585_v0 }
0x197b   :  { %v3570_v21 = vpop.eup %3569 }
0x197c   :  { %v2569_v32 = vsel %vm221_vm3, %v3570_v21, 0.0 }
0x19a3   :  { %v2448_v10 = vpop.f32.mrf.mxu1 }
0x19a4   :  { %v2455_v11 = vadd.f32 %v2448_v10, %v2180_v9 }
0x19a5   :  { %v3419_v13 = vpop.f32.mrf.mxu1 }
0x19a6   :  { %v3500_v13 = vld [vmem:[%s4304_s11 + $0x18] sm:$0xff]  }
0x19a7   :  { %v2451_v26 = vpop.f32.mrf.mxu1 }
0x19a8   :  { %v2456_v17 = vadd.f32 %v2451_v26, %v2183_v15 }
0x19a9   :  { %v3420_v18 = vpop.f32.mrf.mxu1 }
0x19ab   :  { %v2551_v19 = vpop.f32.mrf.mxu1 }
0x19ac   :  { %v2560_v20 = vsel %vm221_vm3, %v2551_v19, -inf }
0x19ad   :  { %2561 = vmax.xlane.f32.xlu0 %v2560_v20  ;;  %v3431_v25 = vpop.f32.mrf.mxu1 }
0x19af   :  { %v2554_v31 = vpop.f32.mrf.mxu1 }
0x19b0   :  { %v3051_v31 = vld [vmem:[%s4295_s12 + $0xd] ss:$0 sm:$0xff] }
0x19b1   :  { %v3432_v33 = vpop.f32.mrf.mxu1  ;;  %2570 = vadd.xlane.f32.xlu0 %v2569_v32 }
0x1a36   :  { %v2562_v22 = vpop.xlane.xlu0 %2561 }
0x1a37   :  { %v2564_v14 = vsub.f32 %v2551_v19, %v2562_v22 }
0x1a39   :  { %v2567_v29 = vmul.f32 1.442695, %v2564_v14  ;;  %v3052_v14 = vld [vmem:[%s4295_s12 + $0xe] ss:$0 sm:$0xff] }
0x1a3a   :  { %v2571_v34 = vpop.xlane.xlu0 %2570 }
0x1a3b   :  { %3571 = vpow2.f32 %v2567_v29 }
0x1a3c   :  { %3573 = vrcp.f32 %v2571_v34 }
0x1a48   :  { %v3572_v63 = vpop.eup %3571 }
0x1a49   :  { %v3574_v16 = vpop.eup %3573  ;;  %v2572_v35 = vsel %vm221_vm3, %v3572_v63, 0.0 }
0x1a4a   :  { %2573 = vadd.xlane.f32.xlu0 %v2572_v35  ;;  %v2577_v37 = vmul.f32 %v3574_v16, %v3570_v21  ;;  %v3501_v35 = vld [vmem:[%s4304_s11 + $0x10] sm:$0xff]  }
0x1a4c   :  { %v2579_v27 = vpack.c.bf16 %v2577_v37, %v2577_v37  ;;  %v3502_v37 = vld [vmem:[%s4304_s11 + $0x8] sm:$0xff]  }
0x1a4e   :  { %3436 = vmatmul.mubr.msk.bf16.vlgmr.msra.gmra.mxu0 %vm221_vm3, %v2579_v27  ;;  %v3503_v27 = vld [vmem:[%s4304_s11] sm:$0xff]  }
0x1a4f   :  { %3447 = vmatprep.mubr.msk.bf16.mxu0 %vm3586_vm0, %v3585_v0  ;;  %3446 = vmatpush3.bf16.msra.mxu0 %v2683_v47 }
0x1a50   :  { %3459 = vmatprep.subr.bf16.mxu0 %v3585_v0 }
0x1a60   :  { %2629 = vrot.lane.b32.xlu0 %v4055_v30, %s3598_s7 }
0x1ad3   :  { %v2574_v38 = vpop.xlane.xlu0 %2573 }
0x1ad4   :  { %3575 = vrcp.f32 %v2574_v38 }
0x1ad7   :  { %v2630_v39 = vpop.permute.xlu0 %2629 }
0x1ad8   :  { %v2635_v40 = vsel %vm344_vm4, %v2630_v39, 0 }
0x1ad9   :  { %3440 = vmatpush3.bf16.msra.mxu1 %v2635_v40 }
0x1ada   :  { %3451 = vmatprep.subr.bf16.mxu1 %v3585_v0 }
0x1ae1   :  { %v3576_v41 = vpop.eup %3575 }
0x1ae2   :  { %v2578_v42 = vmul.f32 %v3576_v41, %v3572_v63 }
0x1ae4   :  { %v2580_v30 = vpack.c.bf16 %v2578_v42, %v2578_v42 }
0x1ae6   :  { %3442 = vmatmul.mubr.msk.bf16.vlgmr.msra.gmra.mxu1 %vm221_vm3, %v2580_v30 }
0x1ae7   :  { %3455 = vmatprep.mubr.msk.bf16.mxu1 %vm3586_vm0, %v3585_v0 }
0x1b0e   :  { %v2623_v44 = vpop.f32.mrf.mxu0 }
0x1b10   :  { %v3437_v5 = vpop.f32.mrf.mxu0 }
0x1b12   :  { %v2626_v28 = vpop.f32.mrf.mxu0 }
0x1b13   :  { %v3062_v28 = vld [vmem:[%s4295_s12 + $0xf] ss:$0 sm:$0xff] }
0x1b14   :  { %v3438_v48 = vpop.f32.mrf.mxu0 }
0x1ba6   :  { %v2671_v49 = vpop.f32.mrf.mxu1 }
0x1ba7   :  { %v2677_v45 = vpack.c.bf16 %v2671_v49, %v2623_v44 }
0x1ba8   :  { %v3443_v50 = vpop.f32.mrf.mxu1 }
0x1ba9   :  { %3448 = vmatmul.mubr.msk.bf16.vlgmr.msra.gmra.mxu0 %vm221_vm3, %v2677_v45 }
0x1baa   :  { %v2674_v51 = vpop.f32.mrf.mxu1  ;;  %3467 = vmatprep.mubr.msk.bf16.mxu0 %vm3586_vm0, %v3585_v0  ;;  %3460 = vmatpush3.bf16.msra.mxu0 %v3500_v13 }
0x1bab   :  { %3461 = vmatprep.subr.bf16.mxu0 %v3585_v0 }
0x1bac   :  { %v3444_v52 = vpop.f32.mrf.mxu1 }
0x1bae   :  { %3462 = vmatpush3.bf16.msra.mxu0 %v3501_v35 }
0x1baf   :  { %3463 = vmatprep.subr.bf16.mxu0 %v3585_v0 }
0x1bb2   :  { %3464 = vmatpush3.bf16.msra.mxu0 %v3502_v37 }
0x1bb3   :  { %3465 = vmatprep.subr.bf16.mxu0 %v3585_v0 }
0x1bb6   :  { %3466 = vmatpush3.bf16.msra.mxu0 %v3503_v27 }
0x1c69   :  { %v2719_v53 = vpop.f32.mrf.mxu0 }
0x1c6a   :  { %v2726_v55 = vadd.f32 %v2719_v53, %v2455_v11  ;;  %v3499_v11 = vld [vmem:[%s4303_s10] sm:$0xff]  }
0x1c6b   :  { %v3449_v24 = vpop.f32.mrf.mxu0 }
0x1c6c   :  { %v2733_v43 = vadd.f32 %v3050_v54, %v2726_v55 }
0x1c6d   :  { %v2722_v58 = vpop.f32.mrf.mxu0 }
0x1c6e   :  { %v2727_v59 = vadd.f32 %v2722_v58, %v2456_v17  ;;  %v2735_v60 = vadd.f32 %v2733_v43, %v4012_v56 }
0x1c6f   :  { %v3450_v46 = vpop.f32.mrf.mxu0 }
0x1c70   :  { %v2734_v61 = vadd.f32 %v3050_v54, %v2727_v59  ;;  %v2737_v36 = vsel %vm80_vm2, %v2735_v60, 0.0 }
0x1c71   :  { %2738 = vadd.xlane.f32.xlu1 %v2737_v36 }
0x1c72   :  { %v2736_v23 = vadd.f32 %v2734_v61, %v4014_v57  ;;  %v3498_v57 = vld [vmem:[%s4303_s10 + $0x8] sm:$0xff]  }
0x1c73   :  { %3452 = vmatpush3.bf16.msra.mxu1 %v3498_v57 }
0x1c74   :  { %v2740_v62 = vsel %vm80_vm2, %v2736_v23, 0.0  ;;  %3453 = vmatprep.subr.bf16.mxu1 %v3585_v0 }
0x1c75   :  { %2741 = vadd.xlane.f32.xlu0 %v2740_v62 }
0x1c77   :  { %3454 = vmatpush3.bf16.msra.mxu1 %v3499_v11 }
0x1cfa   :  { %v2739_v1 = vpop.xlane.xlu1 %2738 }
0x1cfb   :  { %v2743_v2 = vmul.f32 0.03125, %v2739_v1 }
0x1cfd   :  { %v2745_v3 = vsub.f32 %v2735_v60, %v2743_v2 }
0x1cfe   :  { %v2742_v4 = vpop.xlane.xlu0 %2741 }
0x1cff   :  { %v2744_v6 = vmul.f32 0.03125, %v2742_v4  ;;  %v2747_v7 = vmul.f32 %v2745_v3, %v2745_v3 }
0x1d01   :  { %v2746_v8 = vsub.f32 %v2736_v23, %v2744_v6  ;;  %v2749_v9 = vsel %vm80_vm2, %v2747_v7, 0.0 }
0x1d02   :  { %2750 = vadd.xlane.f32.xlu1 %v2749_v9  ;;  %v3063_v9 = vld [vmem:[%s4295_s12 + $0x10] ss:$0 sm:$0xff] }
0x1d03   :  { %v2748_v56 = vmul.f32 %v2746_v8, %v2746_v8 }
0x1d05   :  { %v2752_v10 = vsel %vm80_vm2, %v2748_v56, 0.0 }
0x1d06   :  { %2753 = vadd.xlane.f32.xlu0 %v2752_v10  ;;  %v3064_v10 = vld [vmem:[%s4295_s12 + $0x11] ss:$0 sm:$0xff] }
0x1d8b   :  { %v2751_v15 = vpop.xlane.xlu1 %2750 }
0x1d8c   :  { %v2755_v26 = vmul.f32 0.03125, %v2751_v15 }
0x1d8e   :  { %v2757_v17 = vadd.f32 1e-05, %v2755_v26 }
0x1d8f   :  { %v2754_v18 = vpop.xlane.xlu0 %2753 }
0x1d90   :  { %3577 = vrsqrt.f32 %v2757_v17  ;;  %v2756_v19 = vmul.f32 0.03125, %v2754_v18 }
0x1d92   :  { %v2758_v20 = vadd.f32 1e-05, %v2756_v19 }
0x1d94   :  { %3579 = vrsqrt.f32 %v2758_v20 }
0x1d9d   :  { %v3578_v21 = vpop.eup %3577 }
0x1d9e   :  { %v2761_v25 = vmul.f32 %v3578_v21, %v2745_v3 }
0x1da0   :  { %v2768_v22 = vmul.f32 %v3051_v31, %v2761_v25 }
0x1da1   :  { %v3580_v32 = vpop.eup %3579 }
0x1da2   :  { %v2762_v33 = vmul.f32 %v3580_v32, %v2746_v8  ;;  %v2775_v34 = vadd.f32 %v3052_v14, %v2768_v22 }
0x1da4   :  { %v2769_v29 = vmul.f32 %v3051_v31, %v2762_v33 }
0x1da6   :  { %v2776_v63 = vadd.f32 %v3052_v14, %v2769_v29 }
0x1da8   :  { %v2777_v16 = vpack.c.bf16 %v2776_v63, %v2775_v34 }
0x1daa   :  { %3456 = vmatmul.mubr.msk.bf16.vlgmr.msra.gmra.mxu1 %vm80_vm2, %v2777_v16 }
0x1e6a   :  { %v2836_v47 = vpop.f32.mrf.mxu1 }
0x1e6b   :  { %v2837_v39 = vadd.f32 %v3053_v12, %v2836_v47 }
0x1e6c   :  { %v3457_v38 = vpop.f32.mrf.mxu1 }
0x1e6d   :  { %v2843_v30 = vmax.f32 %v2837_v39, 0.0 }
0x1e6e   :  { %v2839_v40 = vpop.f32.mrf.mxu1 }
0x1e6f   :  { %v2840_v41 = vadd.f32 %v3053_v12, %v2839_v40 }
0x1e70   :  { %v3458_v42 = vpop.f32.mrf.mxu1 }
0x1e71   :  { %v2844_v44 = vmax.f32 %v2840_v41, 0.0 }
0x1e73   :  { %v2845_v5 = vpack.c.bf16 %v2844_v44, %v2843_v30 }
0x1e75   :  { %3468 = vmatmul.mubr.msk.bf16.vlgmr.msra.gmra.mxu0 %vm1454_vm5, %v2845_v5 }
0x1f35   :  { %v2915_v0 = vpop.f32.mrf.mxu0 }
0x1f36   :  { %v2922_v48 = vadd.f32 %v2915_v0, %v2775_v34 }
0x1f37   :  { %v3469_v49 = vpop.f32.mrf.mxu0 }
0x1f38   :  { %v2929_v45 = vadd.f32 %v3062_v28, %v2922_v48 }
0x1f39   :  { %v2918_v50 = vpop.f32.mrf.mxu0 }
0x1f3a   :  { %v2923_v51 = vadd.f32 %v2918_v50, %v2776_v63  ;;  %v2931_v52 = vsel %vm80_vm2, %v2929_v45, 0.0 }
0x1f3b   :  { %2932 = vadd.xlane.f32.xlu1 %v2931_v52  ;;  %v3470_v53 = vpop.f32.mrf.mxu0 }
0x1f3c   :  { %v2930_v54 = vadd.f32 %v3062_v28, %v2923_v51 }
0x1f3e   :  { %v2934_v55 = vsel %vm80_vm2, %v2930_v54, 0.0 }
0x1f3f   :  { %2935 = vadd.xlane.f32.xlu0 %v2934_v55 }
0x1fc4   :  { %v2933_v24 = vpop.xlane.xlu1 %2932 }
0x1fc5   :  { %v2937_v43 = vmul.f32 0.03125, %v2933_v24 }
0x1fc7   :  { %v2939_v58 = vsub.f32 %v2929_v45, %v2937_v43 }
0x1fc8   :  { %v2936_v59 = vpop.xlane.xlu0 %2935 }
0x1fc9   :  { %v2938_v60 = vmul.f32 0.03125, %v2936_v59  ;;  %v2941_v46 = vmul.f32 %v2939_v58, %v2939_v58 }
0x1fcb   :  { %v2940_v61 = vsub.f32 %v2930_v54, %v2938_v60  ;;  %v2943_v36 = vsel %vm80_vm2, %v2941_v46, 0.0 }
0x1fcc   :  { %2944 = vadd.xlane.f32.xlu1 %v2943_v36 }
0x1fcd   :  { %v2942_v23 = vmul.f32 %v2940_v61, %v2940_v61 }
0x1fcf   :  { %v2946_v62 = vsel %vm80_vm2, %v2942_v23, 0.0 }
0x1fd0   :  { %2947 = vadd.xlane.f32.xlu0 %v2946_v62 }
0x2055   :  { %v2945_v1 = vpop.xlane.xlu1 %2944 }
0x2056   :  { %v2949_v2 = vmul.f32 0.03125, %v2945_v1 }
0x2058   :  { %v2951_v3 = vadd.f32 1e-05, %v2949_v2 }
0x2059   :  { %v2948_v4 = vpop.xlane.xlu0 %2947 }
0x205a   :  { %3581 = vrsqrt.f32 %v2951_v3  ;;  %v2950_v6 = vmul.f32 0.03125, %v2948_v4 }
0x205c   :  { %v2952_v7 = vadd.f32 1e-05, %v2950_v6 }
0x205e   :  { %3583 = vrsqrt.f32 %v2952_v7 }
0x2067   :  { %v3582_v8 = vpop.eup %3581 }
0x2068   :  { %v2955_v56 = vmul.f32 %v3582_v8, %v2939_v58 }
0x206a   :  { %v2962_v57 = vmul.f32 %v3063_v9, %v2955_v56 }
0x206b   :  { %v3584_v11 = vpop.eup %3583 }
0x206c   :  { %v2969_v13 = vadd.f32 %v3064_v10, %v2962_v57  ;;  %v2956_v15 = vmul.f32 %v3584_v11, %v2940_v61 }
0x206e   :  { %2971 = vst.msk [vmem:[%s4305_s14] sm:$0xff] %vm80_vm2, %v2969_v13  ;;  %v2963_v26 = vmul.f32 %v3063_v9, %v2956_v15 }
0x2070   :  { %v2970_v17 = vadd.f32 %v3064_v10, %v2963_v26 }
0x2072   :  { %2972 = vst.msk [vmem:[%s4305_s14 + $0x8] sm:$0xff] %vm80_vm2, %v2970_v17 }

</bundles_post_ra>
